<compile_context>
chip_gen: v7x
topology: tpu7x:2x2x1
jax: 0.10.0
libtpu: 0.0.40
codegen_flags: <defaults>
</compile_context>

<pallas_src>
import functools

import jax
import jax.numpy as jnp
from jax import lax
from jax.experimental import pallas as pl
from jax.experimental.pallas import tpu as pltpu

EPS = 1e-5
_LANE_TILE_CAP = 2048   # max pixels per lane tile (multiple of 128)
_SMALL_HW = 512         # below this, batch several images per grid step
_LANE_BUDGET = 2048     # max K*HW lanes per grid step when batching images


def _images_per_block(n: int, hw: int) -> int:
    """Largest divisor of n with k*hw within the lane budget (small-HW batching)."""
    if hw > _SMALL_HW:
        return 1
    for k in range(n, 0, -1):
        if n % k == 0 and k * hw <= _LANE_BUDGET:
            return k
    return 1


def _lane_tiling(hw: int):
    """Returns (tile, n_tiles, tail_needs_mask) for the pixel (lane) axis."""
    if hw <= _LANE_TILE_CAP:
        return hw, 1, False                      # full-extent lane block: always legal
    t = _LANE_TILE_CAP                           # lane-dense 128-multiple tiles
    return t, pl.cdiv(hw, t), (hw % t != 0)


# --------------- phase 1: global BN statistics (sum(y), sum(y*y)) ---------------

def _stats_kernel(w_ref, x_ref, sum_ref, sq_ref, *, k, hw, tile, need_mask):
    # w_ref:   (Cout, Cin) bf16          x_ref: (k, Cin, T) caller dtype
    # sum_ref: (Cout, 1)   f32 partial   sq_ref: (Cout, 1) f32 partial
    # One partial pair per leading-"parallel" partition -> no racy accumulation.
    @pl.when((pl.program_id(1) == 0) & (pl.program_id(2) == 0))
    def _():
        sum_ref[...] = jnp.zeros_like(sum_ref)
        sq_ref[...] = jnp.zeros_like(sq_ref)

    w = w_ref[...]
    if need_mask:
        # Ragged tail block: zero out lanes past HW before they hit the stats.
        valid = hw - pl.program_id(2) * tile
        mask = lax.broadcasted_iota(jnp.int32, (1, tile), 1) < valid
    for i in range(k):                           # small static unroll over images
        xi = x_ref[i]
        if need_mask:
            xi = jnp.where(mask, xi, jnp.zeros_like(xi))
        y = jnp.dot(w, xi.astype(jnp.bfloat16),
                    preferred_element_type=jnp.float32)     # (Cout, T) on the MXU
        sum_ref[...] += jnp.sum(y, axis=1, keepdims=True)
        sq_ref[...] += jnp.sum(y * y, axis=1, keepdims=True)


# ------------- phase 2: 1x1 conv (matmul, scale pre-folded) + shift + ReLU -------

def _apply_kernel(w_ref, shift_ref, x_ref, o_ref, *, k):
    # w_ref: (Cout, Cin) bf16, gamma*inv_std already folded in.
    # shift_ref: (Cout, 1) f32.   x_ref: (k, Cin, T).   o_ref: (k, Cout, T).
    w = w_ref[...]
    shift = shift_ref[...]
    for i in range(k):
        y = jnp.dot(w, x_ref[i].astype(jnp.bfloat16),
                    preferred_element_type=jnp.float32)
        o_ref[i] = jnp.maximum(y + shift, 0.0).astype(o_ref.dtype)


def bottleneck1_forward(x_nchw, w4, gamma4, beta4, *, out_dtype=jnp.bfloat16):
    """x_nchw: (N, 64, H, W); w4: (256, 64, 1, 1); gamma4/beta4: (256,) f32.

    Returns relu(batchnorm4(conv4(x_nchw))) with training-mode batch statistics.
    Pass out_dtype=jnp.float32 to recover the module's original output dtype.
    """
    N, Cin, H, W = x_nchw.shape
    Cout = w4.shape[0]
    HW = H * W
    M = N * HW

    T, n_hw, need_mask = _lane_tiling(HW)
    K = _images_per_block(N, HW)                 # images per grid step
    NB = N // K                                  # image-blocks
    P = 2 if (NB % 2 == 0 and NB >= 2) else 1    # stats partitions (one per TC on v7x)
    NBP = NB // P

    x = x_nchw.reshape(N, Cin, HW)               # free, contiguous reshape
    w_bf16 = w4.reshape(Cout, Cin).astype(jnp.bfloat16)
    x_bytes = x.dtype.itemsize
    out_bytes = jnp.dtype(out_dtype).itemsize

    # ---- phase 1: per-partition sum(y) / sum(y*y) over all pixels ----
    sum_p, sq_p = pl.pallas_call(
        functools.partial(_stats_kernel, k=K, hw=HW, tile=T, need_mask=need_mask),
        out_shape=(jax.ShapeDtypeStruct((P, Cout, 1), jnp.float32),
                   jax.ShapeDtypeStruct((P, Cout, 1), jnp.float32)),
        grid=(P, NBP, n_hw),
        in_specs=[
            pl.BlockSpec((Cout, Cin), lambda p, n, t: (0, 0)),
            pl.BlockSpec((K, Cin, T), lambda p, n, t: (p * NBP + n, 0, t)),
        ],
        out_specs=(pl.BlockSpec((None, Cout, 1), lambda p, n, t: (p, 0, 0)),
                   pl.BlockSpec((None, Cout, 1), lambda p, n, t: (p, 0, 0))),
        compiler_params=pltpu.CompilerParams(
            dimension_semantics=("parallel", "arbitrary", "arbitrary")),
        cost_estimate=pl.CostEstimate(
            flops=2 * M * Cin * Cout + 3 * M * Cout,
            transcendentals=0,
            bytes_accessed=M * Cin * x_bytes + Cout * Cin * 2 + 2 * P * Cout * 4),
    )(w_bf16, x)

    # ---- tiny glue: fold stats into per-channel scale/shift (256 channels) ----
    sum_y = jnp.sum(sum_p, axis=0)                              # (Cout, 1)
    sum_y2 = jnp.sum(sq_p, axis=0)                              # (Cout, 1)
    inv_m = 1.0 / float(M)
    mean_y = sum_y * inv_m
    var = jnp.maximum(sum_y2 * inv_m - mean_y * mean_y, 0.0)    # clamp: cancellation guard
    inv_std = lax.rsqrt(var + EPS)
    scale = gamma4[:, None] * inv_std                           # (Cout, 1) f32
    shift = beta4[:, None] - mean_y * scale                     # (Cout, 1) f32
    # Fold gamma*inv_std into the (bf16-rounded) weight -> apply kernel does y+shift.
    w_scaled = (w_bf16.astype(jnp.float32) * scale).astype(jnp.bfloat16)

    # ---- phase 2: per-tile matmul + shift + ReLU, fully parallel grid ----
    out = pl.pallas_call(
        functools.partial(_apply_kernel, k=K),
        out_shape=jax.ShapeDtypeStruct((N, Cout, HW), out_dtype),
        grid=(NB, n_hw),
        in_specs=[
            pl.BlockSpec((Cout, Cin), lambda n, t: (0, 0)),
            pl.BlockSpec((Cout, 1), lambda n, t: (0, 0)),
            pl.BlockSpec((K, Cin, T), lambda n, t: (n, 0, t)),
        ],
        out_specs=pl.BlockSpec((K, Cout, T), lambda n, t: (n, 0, t)),
        compiler_params=pltpu.CompilerParams(
            dimension_semantics=("parallel", "parallel")),
        cost_estimate=pl.CostEstimate(
            flops=2 * M * Cin * Cout + 2 * M * Cout,
            transcendentals=0,
            bytes_accessed=M * Cin * x_bytes + M * Cout * out_bytes
                           + Cout * (Cin * 2 + 4)),
    )(w_scaled, shift, x)

    return out.reshape(N, Cout, H, W)


def _reference(x_nchw, w4, gamma4, beta4):
    """Pure-JAX f32 reference of relu(bn4(conv4(x1))) with training-mode BN."""
    Cout, Cin = w4.shape[0], w4.shape[1]
    w_mat = w4.reshape(Cout, Cin)
    y = jnp.einsum('oc,nchw->nohw', w_mat, x_nchw, precision=lax.Precision.HIGHEST)
    mean = jnp.mean(y, axis=(0, 2, 3), keepdims=True)
    var = jnp.mean((y - mean) ** 2, axis=(0, 2, 3), keepdims=True)
    out = (y - mean) / jnp.sqrt(var + EPS) \
        * gamma4[None, :, None, None] + beta4[None, :, None, None]
    return jnp.maximum(out, 0.0)


if __name__ == "__main__":
    key = jax.random.PRNGKey(0)
    k_x, k_w, k_x2 = jax.random.split(key, 3)

    Cin, Cout = 64, 256                      # conv4 is 64 -> 256 (fixed by the module)
    bound = 1.0 / (Cin ** 0.5)               # PyTorch kaiming-uniform bound
    w4 = jax.random.uniform(k_w, (Cout, Cin, 1, 1), jnp.float32, -bound, bound)
    gamma4 = jnp.ones((Cout,), jnp.float32)  # BatchNorm2d default affine weight
    beta4 = jnp.zeros((Cout,), jnp.float32)  # BatchNorm2d default affine bias

    # --- test 1: small feature map (exercises image batching), bf16 output ---
    N, H, W = 2, 16, 16
    x1 = jax.random.normal(k_x, (N, Cin, H, W), dtype=jnp.float32)
    out = jax.block_until_ready(bottleneck1_forward(x1, w4, gamma4, beta4))
    ref = _reference(x1, w4, gamma4, beta4)
    assert out.shape == (N, Cout, H, W) and out.dtype == jnp.bfloat16
    err = float(jnp.max(jnp.abs(out.astype(jnp.float32) - ref)))
    assert err < 7e-2, f"bf16-out max abs error {err}"

    # --- test 2: HW > lane tile (exercises cdiv tiling + tail masking + 2-way
    #     partitioned stats), f32 output ---
    N2, H2, W2 = 2, 48, 48
    x2 = jax.random.normal(k_x2, (N2, Cin, H2, W2), dtype=jnp.float32)
    out2 = jax.block_until_ready(
        bottleneck1_forward(x2, w4, gamma4, beta4, out_dtype=jnp.float32))
    ref2 = _reference(x2, w4, gamma4, beta4)
    assert out2.shape == (N2, Cout, H2, W2) and out2.dtype == jnp.float32
    err2 = float(jnp.max(jnp.abs(out2 - ref2)))
    assert err2 < 4e-2, f"f32-out max abs error {err2}"

    print("KERNEL_OK")
</pallas_src>

<mosaic_0001>
module attributes {stable_mosaic.version = 11 : i64} {
  func.func @_stats_kernel(%arg0: i32, %arg1: i32, %arg2: i32, %arg3: memref<256x64xbf16, #tpu.memory_space<vmem>>, %arg4: memref<2x64x256xf32, #tpu.memory_space<vmem>>, %arg5: memref<1x256x1xf32, #tpu.memory_space<vmem>>, %arg6: memref<1x256x1xf32, #tpu.memory_space<vmem>>) attributes {dimension_semantics = [#tpu.dimension_semantics<parallel>, #tpu.dimension_semantics<arbitrary>, #tpu.dimension_semantics<arbitrary>], iteration_bounds = array<i64: 1, 1, 1>, scalar_prefetch = 0 : i64, scratch_operands = 0 : i64, tpu.core_type = #tpu.core_type<tc>, window_params = [{pipeline_mode = #tpu.pipeline_mode<synchronous>, transform_indices = @transform_0, window_bounds = array<i64: 256, 64>}, {transform_indices = @transform_1, window_bounds = array<i64: 2, 64, 256>}, {transform_indices = @transform_2, window_bounds = array<i64: 1, 256, 1>}, {transform_indices = @transform_3, window_bounds = array<i64: 1, 256, 1>}]} {
    %c0_i32 = arith.constant 0 : i32
    %0 = arith.cmpi eq, %arg1, %c0_i32 : i32
    %c0_i32_0 = arith.constant 0 : i32
    %1 = arith.cmpi eq, %arg2, %c0_i32_0 : i32
    %2 = arith.andi %0, %1 : i1
    %3 = arith.extui %2 : i1 to i32
    %c0_i32_1 = arith.constant 0 : i32
    %4 = arith.cmpi ne, %3, %c0_i32_1 : i32
    scf.if %4 {
      %cst_37 = arith.constant 0.000000e+00 : f32
      %48 = vector.broadcast %cst_37 : f32 to vector<256x1xf32>
      %c0_38 = arith.constant 0 : index
      %c0_39 = arith.constant 0 : index
      %c0_40 = arith.constant 0 : index
      %49 = vector.load %arg5[%c0_38, %c0_39, %c0_40] : memref<1x256x1xf32, #tpu.memory_space<vmem>>, vector<1x256x1xf32>
      %50 = vector.shape_cast %49 : vector<1x256x1xf32> to vector<256x1xf32>
      %51 = vector.shape_cast %48 : vector<256x1xf32> to vector<1x256x1xf32>
      tpu.vector_store %arg5[%c0_38, %c0_39, %c0_40], %51 {strides = array<i32>} : memref<1x256x1xf32, #tpu.memory_space<vmem>>, vector<1x256x1xf32>,
      %cst_41 = arith.constant 0.000000e+00 : f32
      %52 = vector.broadcast %cst_41 : f32 to vector<256x1xf32>
      %c0_42 = arith.constant 0 : index
      %c0_43 = arith.constant 0 : index
      %c0_44 = arith.constant 0 : index
      %53 = vector.load %arg6[%c0_42, %c0_43, %c0_44] : memref<1x256x1xf32, #tpu.memory_space<vmem>>, vector<1x256x1xf32>
      %54 = vector.shape_cast %53 : vector<1x256x1xf32> to vector<256x1xf32>
      %55 = vector.shape_cast %52 : vector<256x1xf32> to vector<1x256x1xf32>
      tpu.vector_store %arg6[%c0_42, %c0_43, %c0_44], %55 {strides = array<i32>} : memref<1x256x1xf32, #tpu.memory_space<vmem>>, vector<1x256x1xf32>,
    } else {
    }
    %c0 = arith.constant 0 : index
    %c0_2 = arith.constant 0 : index
    %5 = vector.load %arg3[%c0, %c0_2] : memref<256x64xbf16, #tpu.memory_space<vmem>>, vector<256x64xbf16>
    %c0_3 = arith.constant 0 : index
    %c0_4 = arith.constant 0 : index
    %c0_5 = arith.constant 0 : index
    %6 = vector.load %arg4[%c0_3, %c0_4, %c0_5] : memref<2x64x256xf32, #tpu.memory_space<vmem>>, vector<1x64x256xf32>
    %7 = vector.shape_cast %6 : vector<1x64x256xf32> to vector<64x256xf32>
    %8 = arith.truncf %7 : vector<64x256xf32> to vector<64x256xbf16>
    %cst = arith.constant dense<0.000000e+00> : vector<256x256xf32>
    %9 = tpu.matmul %5, %8, %cst {dimension_numbers = #tpu.dot_dimension_numbers<[1], [0], [0], [1], [0, 0, 1, 1], [], []>} : vector<256x64xbf16>, vector<64x256xbf16>, vector<256x256xf32> -> vector<256x256xf32>
    %c0_6 = arith.constant 0 : index
    %c0_7 = arith.constant 0 : index
    %c0_8 = arith.constant 0 : index
    %10 = vector.load %arg5[%c0_6, %c0_7, %c0_8] : memref<1x256x1xf32, #tpu.memory_space<vmem>>, vector<1x256x1xf32>
    %11 = vector.shape_cast %10 : vector<1x256x1xf32> to vector<256x1xf32>
    %cst_9 = arith.constant dense<0.000000e+00> : vector<256xf32>
    %12 = vector.multi_reduction <add>, %9, %cst_9 [1] : vector<256x256xf32> to vector<256xf32>
    %13 = vector.shape_cast %12 : vector<256xf32> to vector<256x1xf32>
    %14 = arith.addf %11, %13 : vector<256x1xf32>
    %c0_10 = arith.constant 0 : index
    %c0_11 = arith.constant 0 : index
    %c0_12 = arith.constant 0 : index
    %15 = vector.load %arg5[%c0_10, %c0_11, %c0_12] : memref<1x256x1xf32, #tpu.memory_space<vmem>>, vector<1x256x1xf32>
    %16 = vector.shape_cast %15 : vector<1x256x1xf32> to vector<256x1xf32>
    %17 = vector.shape_cast %14 : vector<256x1xf32> to vector<1x256x1xf32>
    tpu.vector_store %arg5[%c0_10, %c0_11, %c0_12], %17 {strides = array<i32>} : memref<1x256x1xf32, #tpu.memory_space<vmem>>, vector<1x256x1xf32>,
    %c0_13 = arith.constant 0 : index
    %c0_14 = arith.constant 0 : index
    %c0_15 = arith.constant 0 : index
    %18 = vector.load %arg6[%c0_13, %c0_14, %c0_15] : memref<1x256x1xf32, #tpu.memory_space<vmem>>, vector<1x256x1xf32>
    %19 = vector.shape_cast %18 : vector<1x256x1xf32> to vector<256x1xf32>
    %20 = arith.mulf %9, %9 : vector<256x256xf32>
    %cst_16 = arith.constant dense<0.000000e+00> : vector<256xf32>
    %21 = vector.multi_reduction <add>, %20, %cst_16 [1] : vector<256x256xf32> to vector<256xf32>
    %22 = vector.shape_cast %21 : vector<256xf32> to vector<256x1xf32>
    %23 = arith.addf %19, %22 : vector<256x1xf32>
    %c0_17 = arith.constant 0 : index
    %c0_18 = arith.constant 0 : index
    %c0_19 = arith.constant 0 : index
    %24 = vector.load %arg6[%c0_17, %c0_18, %c0_19] : memref<1x256x1xf32, #tpu.memory_space<vmem>>, vector<1x256x1xf32>
    %25 = vector.shape_cast %24 : vector<1x256x1xf32> to vector<256x1xf32>
    %26 = vector.shape_cast %23 : vector<256x1xf32> to vector<1x256x1xf32>
    tpu.vector_store %arg6[%c0_17, %c0_18, %c0_19], %26 {strides = array<i32>} : memref<1x256x1xf32, #tpu.memory_space<vmem>>, vector<1x256x1xf32>,
    %c1 = arith.constant 1 : index
    %c0_20 = arith.constant 0 : index
    %c0_21 = arith.constant 0 : index
    %27 = vector.load %arg4[%c1, %c0_20, %c0_21] : memref<2x64x256xf32, #tpu.memory_space<vmem>>, vector<1x64x256xf32>
    %28 = vector.shape_cast %27 : vector<1x64x256xf32> to vector<64x256xf32>
    %29 = arith.truncf %28 : vector<64x256xf32> to vector<64x256xbf16>
    %cst_22 = arith.constant dense<0.000000e+00> : vector<256x256xf32>
    %30 = tpu.matmul %5, %29, %cst_22 {dimension_numbers = #tpu.dot_dimension_numbers<[1], [0], [0], [1], [0, 0, 1, 1], [], []>} : vector<256x64xbf16>, vector<64x256xbf16>, vector<256x256xf32> -> vector<256x256xf32>
    %c0_23 = arith.constant 0 : index
    %c0_24 = arith.constant 0 : index
    %c0_25 = arith.constant 0 : index
    %31 = vector.load %arg5[%c0_23, %c0_24, %c0_25] : memref<1x256x1xf32, #tpu.memory_space<vmem>>, vector<1x256x1xf32>
    %32 = vector.shape_cast %31 : vector<1x256x1xf32> to vector<256x1xf32>
    %cst_26 = arith.constant dense<0.000000e+00> : vector<256xf32>
    %33 = vector.multi_reduction <add>, %30, %cst_26 [1] : vector<256x256xf32> to vector<256xf32>
    %34 = vector.shape_cast %33 : vector<256xf32> to vector<256x1xf32>
    %35 = arith.addf %32, %34 : vector<256x1xf32>
    %c0_27 = arith.constant 0 : index
    %c0_28 = arith.constant 0 : index
    %c0_29 = arith.constant 0 : index
    %36 = vector.load %arg5[%c0_27, %c0_28, %c0_29] : memref<1x256x1xf32, #tpu.memory_space<vmem>>, vector<1x256x1xf32>
    %37 = vector.shape_cast %36 : vector<1x256x1xf32> to vector<256x1xf32>
    %38 = vector.shape_cast %35 : vector<256x1xf32> to vector<1x256x1xf32>
    tpu.vector_store %arg5[%c0_27, %c0_28, %c0_29], %38 {strides = array<i32>} : memref<1x256x1xf32, #tpu.memory_space<vmem>>, vector<1x256x1xf32>,
    %c0_30 = arith.constant 0 : index
    %c0_31 = arith.constant 0 : index
    %c0_32 = arith.constant 0 : index
    %39 = vector.load %arg6[%c0_30, %c0_31, %c0_32] : memref<1x256x1xf32, #tpu.memory_space<vmem>>, vector<1x256x1xf32>
    %40 = vector.shape_cast %39 : vector<1x256x1xf32> to vector<256x1xf32>
    %41 = arith.mulf %30, %30 : vector<256x256xf32>
    %cst_33 = arith.constant dense<0.000000e+00> : vector<256xf32>
    %42 = vector.multi_reduction <add>, %41, %cst_33 [1] : vector<256x256xf32> to vector<256xf32>
    %43 = vector.shape_cast %42 : vector<256xf32> to vector<256x1xf32>
    %44 = arith.addf %40, %43 : vector<256x1xf32>
    %c0_34 = arith.constant 0 : index
    %c0_35 = arith.constant 0 : index
    %c0_36 = arith.constant 0 : index
    %45 = vector.load %arg6[%c0_34, %c0_35, %c0_36] : memref<1x256x1xf32, #tpu.memory_space<vmem>>, vector<1x256x1xf32>
    %46 = vector.shape_cast %45 : vector<1x256x1xf32> to vector<256x1xf32>
    %47 = vector.shape_cast %44 : vector<256x1xf32> to vector<1x256x1xf32>
    tpu.vector_store %arg6[%c0_34, %c0_35, %c0_36], %47 {strides = array<i32>} : memref<1x256x1xf32, #tpu.memory_space<vmem>>, vector<1x256x1xf32>,
    return
  }
  func.func @transform_0(%arg0: i32, %arg1: i32, %arg2: i32) -> (i32, i32) {
    %c0_i32 = arith.constant 0 : i32
    %c0_i32_0 = arith.constant 0 : i32
    %c0_i32_1 = arith.constant 0 : i32
    return %c0_i32, %c0_i32_0 : i32, i32
  }
  func.func @transform_1(%arg0: i32, %arg1: i32, %arg2: i32) -> (i32, i32, i32) {
    %c1_i32 = arith.constant 1 : i32
    %0 = arith.muli %arg0, %c1_i32 : i32
    %1 = arith.addi %0, %arg1 : i32
    %c0_i32 = arith.constant 0 : i32
    %c0_i32_0 = arith.constant 0 : i32
    return %1, %c0_i32, %arg2 : i32, i32, i32
  }
  func.func @transform_2(%arg0: i32, %arg1: i32, %arg2: i32) -> (i32, i32, i32) {
    %c0_i32 = arith.constant 0 : i32
    %c0_i32_0 = arith.constant 0 : i32
    %c0_i32_1 = arith.constant 0 : i32
    return %arg0, %c0_i32, %c0_i32_0 : i32, i32, i32
  }
  func.func @transform_3(%arg0: i32, %arg1: i32, %arg2: i32) -> (i32, i32, i32) {
    %c0_i32 = arith.constant 0 : i32
    %c0_i32_0 = arith.constant 0 : i32
    %c0_i32_1 = arith.constant 0 : i32
    return %arg0, %c0_i32, %c0_i32_0 : i32, i32, i32
  }
}

</mosaic_0001>

<bundles_post_ra>
// kernel: tpu_custom_call.1
= control target key start
LH: loop header
LB: loop body
LE: loop exit
PB: predicated region body
PF: predicated region fallthrough
CT: control target
= control target key end

     0   :  { %9 = vsyncpa [#allocation3], 0  ;;  %s1701_s12 = smov [#allocation2]   ;;  %s3448_s0 = inlined_call_operand.vmem [shape: bf16[256,64], index: 0, kind: input, shape index: {}]   ;;  %s3449_s1 = inlined_call_operand.hbm [shape: f32[2,64,256], index: 1, kind: input, shape index: {}]   ;;  %s3450_s2 = inlined_call_operand.vmem [shape: f32[1,256,1], index: 2, kind: output, shape index: {0}]   ;;  %s3451_s3 = inlined_call_operand.vmem [shape: f32[1,256,1], index: 3, kind: output, shape index: {1}]  }
   0x1   :  { %s22_s13 = sshll.u32 %s1701_s12, 4  ;;  %s1677_s16 = scalar_lea.hbm %s3449_s1, 4096  ;;  %s23_s13 = int_to_ptr.vmem [resolvable:$true] %s22_s13 }
   0x2   :  { %p1678_p0 = scmp.ne.s32.totalorder %s3449_s1, %s1677_s16  ;;  %p1681_p1 = scmp.lt.u32.totalorder %s1677_s16, %s3449_s1 }
   0x4   :  { %p1683_p2 = pnand %p1681_p1, %p1678_p0 }
   0x6   :  { %1686 = shalt.err (!%p1683_p2)
}
   0x7   :  { %s1687_s21 = scalar_lea.vmem %s23_s13, 4096  ;;  %p1692_p4 = scmp.lt.s32.totalorder %s23_s13, %s23_s13 }
   0x8   :  { %p1688_p3 = scmp.ne.s32.totalorder %s23_s13, %s1687_s21  ;;  %p1693_p5 = scmp.lt.s32.totalorder %s1687_s21, %s1687_s21 }
   0xa   :  { %p1694_p6 = por %p1693_p5, %p1692_p4 }
   0xc   :  { %p1695_p7 = pnand %p1694_p6, %p1688_p3 }
   0xe   :  { %1698 = shalt.err (!%p1695_p7)
}
   0xf   :  { %s1702_s22 = smov 256   ;;  %s1703_s23 = smov 16  }
  0x10   :  { %28 = dma.hbm_to_vmem [thread:$0]  %s3449_s1, 4096, %s23_s13, [#allocation3], %s1702_s22, %s1702_s22, %s1703_s23  }
  0x11   :  { %1699 = dma.done.wait [#allocation3], 4096  }
  0x12   :  { %1700 = vsyncadd [#allocation3], 4294963200  ;;  %v1704_v0 = vmov 0   ;;  %v139_v1 = vld [vmem:[#allocation2 + $0x8] sm:$0xff]  ;;  %v141_v2 = vld [vmem:[#allocation2 + $0x18] sm:$0xff]  ;;  %vm242_vm0 = vcmask 523264  }
  0x13   :  { %323 = vmatprep.mubr.bf16.mxu0 %v1704_v0  ;;  %990 = vmatprep.mubr.bf16.mxu1 %v1704_v0  ;;  %v935_v3 = vld [vmem:[#allocation2 + $0x88] sm:$0xff]  ;;  %v155_v4 = vpack.c.bf16 %v141_v2, %v139_v1  ;;  %v937_v5 = vld [vmem:[#allocation2 + $0x98] sm:$0xff]  ;;  %v138_v6 = vld [vmem:[#allocation2] sm:$0xff]  ;;  %vm41_vm1 = vcmask 7168  }
  0x14   :  { %v140_v7 = vld [vmem:[#allocation2 + $0x10] sm:$0xff]  ;;  %v951_v8 = vpack.c.bf16 %v937_v5, %v935_v3  ;;  %v934_v10 = vld [vmem:[#allocation2 + $0x80] sm:$0xff]  ;;  %v143_v12 = vld [vmem:[#allocation2 + $0x28] sm:$0xff] }
  0x15   :  { %v154_v9 = vpack.c.bf16 %v140_v7, %v138_v6  ;;  %v936_v11 = vld [vmem:[#allocation2 + $0x90] sm:$0xff]  ;;  %291 = vmatprep.subr.bf16.mxu0 %v155_v4  ;;  %v145_v14 = vld [vmem:[#allocation2 + $0x38] sm:$0xff]  ;;  %v939_v15 = vld [vmem:[#allocation2 + $0xa8] sm:$0xff] }
  0x16   :  { %v950_v13 = vpack.c.bf16 %v936_v11, %v934_v10  ;;  %v941_v16 = vld [vmem:[#allocation2 + $0xb8] sm:$0xff]  ;;  %958 = vmatprep.subr.bf16.mxu1 %v951_v8  ;;  %v157_v17 = vpack.c.bf16 %v145_v14, %v143_v12  ;;  %v142_v19 = vld [vmem:[#allocation2 + $0x20] sm:$0xff]  ;;  %v144_v20 = vld [vmem:[#allocation2 + $0x30] sm:$0xff] }
  0x17   :  { %292 = vmatpush1.bf16.msra.mxu0 %v154_v9  ;;  %v953_v18 = vpack.c.bf16 %v941_v16, %v939_v15  ;;  %v938_v21 = vld [vmem:[#allocation2 + $0xa0] sm:$0xff]  ;;  %v156_v22 = vpack.c.bf16 %v144_v20, %v142_v19  ;;  %v940_v23 = vld [vmem:[#allocation2 + $0xb0] sm:$0xff]  ;;  %v147_v24 = vld [vmem:[#allocation2 + $0x48] sm:$0xff] }
  0x18   :  { %959 = vmatpush1.bf16.msra.mxu1 %v950_v13  ;;  %v149_v25 = vld [vmem:[#allocation2 + $0x58] sm:$0xff]  ;;  %293 = vmatprep.subr.bf16.mxu0 %v157_v17  ;;  %v952_v26 = vpack.c.bf16 %v940_v23, %v938_v21  ;;  %v943_v28 = vld [vmem:[#allocation2 + $0xc8] sm:$0xff]  ;;  %v146_v30 = vld [vmem:[#allocation2 + $0x40] sm:$0xff] }
  0x19   :  { %960 = vmatprep.subr.bf16.mxu1 %v953_v18  ;;  %v159_v27 = vpack.c.bf16 %v149_v25, %v147_v24  ;;  %v945_v29 = vld [vmem:[#allocation2 + $0xd8] sm:$0xff]  ;;  %v148_v32 = vld [vmem:[#allocation2 + $0x50] sm:$0xff]  ;;  %v942_v33 = vld [vmem:[#allocation2 + $0xc0] sm:$0xff] }
  0x1a   :  { %v955_v31 = vpack.c.bf16 %v945_v29, %v943_v28  ;;  %v944_v34 = vld [vmem:[#allocation2 + $0xd0] sm:$0xff]  ;;  %v158_v35 = vpack.c.bf16 %v148_v32, %v146_v30  ;;  %v151_v36 = vld [vmem:[#allocation2 + $0x68] sm:$0xff]  ;;  %v153_v37 = vld [vmem:[#allocation2 + $0x78] sm:$0xff] }
  0x1b   :  { %294 = vmatpush1.bf16.msra.mxu0 %v156_v22  ;;  %v947_v38 = vld [vmem:[#allocation2 + $0xe8] sm:$0xff]  ;;  %v954_v39 = vpack.c.bf16 %v944_v34, %v942_v33  ;;  %v161_v40 = vpack.c.bf16 %v153_v37, %v151_v36  ;;  %v949_v41 = vld [vmem:[#allocation2 + $0xf8] sm:$0xff]  ;;  %v150_v42 = vld [vmem:[#allocation2 + $0x60] sm:$0xff] }
  0x1c   :  { %961 = vmatpush1.bf16.msra.mxu1 %v952_v26  ;;  %295 = vmatprep.subr.bf16.mxu0 %v159_v27  ;;  %v152_v43 = vld [vmem:[#allocation2 + $0x70] sm:$0xff]  ;;  %v957_v44 = vpack.c.bf16 %v949_v41, %v947_v38  ;;  %v946_v45 = vld [vmem:[#allocation2 + $0xe0] sm:$0xff]  ;;  %v1662_v50 = vld [vmem:[%s3448_s0 + $0x8] sm:$0xff]  }
  0x1d   :  { %962 = vmatprep.subr.bf16.mxu1 %v955_v31  ;;  %v948_v46 = vld [vmem:[#allocation2 + $0xf0] sm:$0xff]  ;;  %v160_v47 = vpack.c.bf16 %v152_v43, %v150_v42  ;;  %v1661_v49 = vld [vmem:[%s3448_s0] sm:$0xff]   ;;  %v1664_v52 = vld [vmem:[%s3448_s0 + $0x18] sm:$0xff]  }
  0x1e   :  { %v956_v48 = vpack.c.bf16 %v948_v46, %v946_v45  ;;  %v1663_v51 = vld [vmem:[%s3448_s0 + $0x10] sm:$0xff]   ;;  %v1665_v53 = vld [vmem:[%s3448_s0 + $0x20] sm:$0xff]   ;;  %v1666_v54 = vld [vmem:[%s3448_s0 + $0x28] sm:$0xff]  }
  0x1f   :  { %296 = vmatpush1.bf16.msra.mxu0 %v158_v35  ;;  %v1667_v55 = vld [vmem:[%s3448_s0 + $0x30] sm:$0xff]   ;;  %v1668_v56 = vld [vmem:[%s3448_s0 + $0x38] sm:$0xff]   ;;  %v1669_v57 = vld [vmem:[%s3448_s0 + $0x40] sm:$0xff]  }
  0x20   :  { %963 = vmatpush1.bf16.msra.mxu1 %v954_v39  ;;  %297 = vmatprep.subr.bf16.mxu0 %v161_v40  ;;  %v1670_v58 = vld [vmem:[%s3448_s0 + $0x48] sm:$0xff]   ;;  %v1671_v59 = vld [vmem:[%s3448_s0 + $0x50] sm:$0xff]   ;;  %v1672_v60 = vld [vmem:[%s3448_s0 + $0x58] sm:$0xff]  }
  0x21   :  { %964 = vmatprep.subr.bf16.mxu1 %v957_v44  ;;  %v1673_v61 = vld [vmem:[%s3448_s0 + $0x60] sm:$0xff]   ;;  %v1674_v62 = vld [vmem:[%s3448_s0 + $0x68] sm:$0xff]   ;;  %v1675_v63 = vld [vmem:[%s3448_s0 + $0x70] sm:$0xff]   ;;  %v1705_v44 = vmov 0.0  }
  0x22   :  { %v1676_v1 = vld [vmem:[%s3448_s0 + $0x78] sm:$0xff]   ;;  %42 = vst.msk [vmem:[%s3450_s2] sm:$0xff] %vm41_vm1, %v1705_v44  ;;  %43 = vst.msk [vmem:[%s3450_s2 + $0x8] sm:$0xff] %vm41_vm1, %v1705_v44 }
  0x23   :  { %298 = vmatpush1.bf16.msra.mxu0 %v160_v47  ;;  %44 = vst.msk [vmem:[%s3450_s2 + $0x10] sm:$0xff] %vm41_vm1, %v1705_v44  ;;  %45 = vst.msk [vmem:[%s3450_s2 + $0x18] sm:$0xff] %vm41_vm1, %v1705_v44 }
  0x24   :  { %965 = vmatpush1.bf16.msra.mxu1 %v956_v48  ;;  %46 = vst.msk [vmem:[%s3450_s2 + $0x20] sm:$0xff] %vm41_vm1, %v1705_v44  ;;  %47 = vst.msk [vmem:[%s3450_s2 + $0x28] sm:$0xff] %vm41_vm1, %v1705_v44 }
  0x25   :  { %48 = vst.msk [vmem:[%s3450_s2 + $0x30] sm:$0xff] %vm41_vm1, %v1705_v44  ;;  %49 = vst.msk [vmem:[%s3450_s2 + $0x38] sm:$0xff] %vm41_vm1, %v1705_v44 }
  0x26   :  { %1624 = vmatmul.mubr.msk.bf16.vlgmr.msra.gmra.mrb[0].mxu0 %vm242_vm0, %v1661_v49  ;;  %50 = vst.msk [vmem:[%s3450_s2 + $0x40] sm:$0xff] %vm41_vm1, %v1705_v44  ;;  %51 = vst.msk [vmem:[%s3450_s2 + $0x48] sm:$0xff] %vm41_vm1, %v1705_v44 }
  0x27   :  { %1640 = vmatmul.mubr.msk.bf16.vlgmr.msra.gmra.mrb[0].mxu1 %vm242_vm0, %v1661_v49  ;;  %333 = vmatprep.mubr.bf16.mxu0 %v1704_v0  ;;  %52 = vst.msk [vmem:[%s3450_s2 + $0x50] sm:$0xff] %vm41_vm1, %v1705_v44  ;;  %53 = vst.msk [vmem:[%s3450_s2 + $0x58] sm:$0xff] %vm41_vm1, %v1705_v44 }
  0x28   :  { %1000 = vmatprep.mubr.bf16.mxu1 %v1704_v0  ;;  %54 = vst.msk [vmem:[%s3450_s2 + $0x60] sm:$0xff] %vm41_vm1, %v1705_v44  ;;  %55 = vst.msk [vmem:[%s3450_s2 + $0x68] sm:$0xff] %vm41_vm1, %v1705_v44 }
  0x29   :  { %56 = vst.msk [vmem:[%s3450_s2 + $0x70] sm:$0xff] %vm41_vm1, %v1705_v44  ;;  %57 = vst.msk [vmem:[%s3450_s2 + $0x78] sm:$0xff] %vm41_vm1, %v1705_v44 }
  0x2a   :  { %58 = vst.msk [vmem:[%s3450_s2 + $0x80] sm:$0xff] %vm41_vm1, %v1705_v44  ;;  %59 = vst.msk [vmem:[%s3450_s2 + $0x88] sm:$0xff] %vm41_vm1, %v1705_v44 }
  0x2b   :  { %60 = vst.msk [vmem:[%s3450_s2 + $0x90] sm:$0xff] %vm41_vm1, %v1705_v44  ;;  %61 = vst.msk [vmem:[%s3450_s2 + $0x98] sm:$0xff] %vm41_vm1, %v1705_v44 }
  0x2c   :  { %62 = vst.msk [vmem:[%s3450_s2 + $0xa0] sm:$0xff] %vm41_vm1, %v1705_v44  ;;  %63 = vst.msk [vmem:[%s3450_s2 + $0xa8] sm:$0xff] %vm41_vm1, %v1705_v44 }
  0x2d   :  { %64 = vst.msk [vmem:[%s3450_s2 + $0xb0] sm:$0xff] %vm41_vm1, %v1705_v44  ;;  %65 = vst.msk [vmem:[%s3450_s2 + $0xb8] sm:$0xff] %vm41_vm1, %v1705_v44 }
  0x2e   :  { %1625 = vmatmul.mubr.msk.bf16.gmra.mrb[4].mxu0 %vm242_vm0, %v1662_v50  ;;  %66 = vst.msk [vmem:[%s3450_s2 + $0xc0] sm:$0xff] %vm41_vm1, %v1705_v44  ;;  %67 = vst.msk [vmem:[%s3450_s2 + $0xc8] sm:$0xff] %vm41_vm1, %v1705_v44 }
  0x2f   :  { %1641 = vmatmul.mubr.msk.bf16.gmra.mrb[4].mxu1 %vm242_vm0, %v1662_v50  ;;  %343 = vmatprep.mubr.bf16.mxu0 %v1704_v0  ;;  %68 = vst.msk [vmem:[%s3450_s2 + $0xd0] sm:$0xff] %vm41_vm1, %v1705_v44  ;;  %69 = vst.msk [vmem:[%s3450_s2 + $0xd8] sm:$0xff] %vm41_vm1, %v1705_v44 }
  0x30   :  { %1010 = vmatprep.mubr.bf16.mxu1 %v1704_v0  ;;  %70 = vst.msk [vmem:[%s3450_s2 + $0xe0] sm:$0xff] %vm41_vm1, %v1705_v44  ;;  %71 = vst.msk [vmem:[%s3450_s2 + $0xe8] sm:$0xff] %vm41_vm1, %v1705_v44 }
  0x31   :  { %72 = vst.msk [vmem:[%s3450_s2 + $0xf0] sm:$0xff] %vm41_vm1, %v1705_v44  ;;  %73 = vst.msk [vmem:[%s3450_s2 + $0xf8] sm:$0xff] %vm41_vm1, %v1705_v44 }
  0x32   :  { %74 = vst.msk [vmem:[%s3451_s3] sm:$0xff] %vm41_vm1, %v1705_v44  ;;  %75 = vst.msk [vmem:[%s3451_s3 + $0x8] sm:$0xff] %vm41_vm1, %v1705_v44 }
  0x33   :  { %76 = vst.msk [vmem:[%s3451_s3 + $0x10] sm:$0xff] %vm41_vm1, %v1705_v44  ;;  %77 = vst.msk [vmem:[%s3451_s3 + $0x18] sm:$0xff] %vm41_vm1, %v1705_v44 }
  0x34   :  { %78 = vst.msk [vmem:[%s3451_s3 + $0x20] sm:$0xff] %vm41_vm1, %v1705_v44  ;;  %79 = vst.msk [vmem:[%s3451_s3 + $0x28] sm:$0xff] %vm41_vm1, %v1705_v44 }
  0x35   :  { %80 = vst.msk [vmem:[%s3451_s3 + $0x30] sm:$0xff] %vm41_vm1, %v1705_v44  ;;  %81 = vst.msk [vmem:[%s3451_s3 + $0x38] sm:$0xff] %vm41_vm1, %v1705_v44 }
  0x36   :  { %1626 = vmatmul.mubr.msk.bf16.gmra.mrb[8].mxu0 %vm242_vm0, %v1663_v51  ;;  %82 = vst.msk [vmem:[%s3451_s3 + $0x40] sm:$0xff] %vm41_vm1, %v1705_v44  ;;  %83 = vst.msk [vmem:[%s3451_s3 + $0x48] sm:$0xff] %vm41_vm1, %v1705_v44 }
  0x37   :  { %1642 = vmatmul.mubr.msk.bf16.gmra.mrb[8].mxu1 %vm242_vm0, %v1663_v51  ;;  %353 = vmatprep.mubr.bf16.mxu0 %v1704_v0  ;;  %84 = vst.msk [vmem:[%s3451_s3 + $0x50] sm:$0xff] %vm41_vm1, %v1705_v44  ;;  %85 = vst.msk [vmem:[%s3451_s3 + $0x58] sm:$0xff] %vm41_vm1, %v1705_v44 }
  0x38   :  { %1020 = vmatprep.mubr.bf16.mxu1 %v1704_v0  ;;  %86 = vst.msk [vmem:[%s3451_s3 + $0x60] sm:$0xff] %vm41_vm1, %v1705_v44  ;;  %87 = vst.msk [vmem:[%s3451_s3 + $0x68] sm:$0xff] %vm41_vm1, %v1705_v44 }
  0x39   :  { %88 = vst.msk [vmem:[%s3451_s3 + $0x70] sm:$0xff] %vm41_vm1, %v1705_v44  ;;  %89 = vst.msk [vmem:[%s3451_s3 + $0x78] sm:$0xff] %vm41_vm1, %v1705_v44 }
  0x3a   :  { %90 = vst.msk [vmem:[%s3451_s3 + $0x80] sm:$0xff] %vm41_vm1, %v1705_v44  ;;  %91 = vst.msk [vmem:[%s3451_s3 + $0x88] sm:$0xff] %vm41_vm1, %v1705_v44 }
  0x3b   :  { %92 = vst.msk [vmem:[%s3451_s3 + $0x90] sm:$0xff] %vm41_vm1, %v1705_v44  ;;  %93 = vst.msk [vmem:[%s3451_s3 + $0x98] sm:$0xff] %vm41_vm1, %v1705_v44 }
  0x3c   :  { %94 = vst.msk [vmem:[%s3451_s3 + $0xa0] sm:$0xff] %vm41_vm1, %v1705_v44  ;;  %95 = vst.msk [vmem:[%s3451_s3 + $0xa8] sm:$0xff] %vm41_vm1, %v1705_v44 }
  0x3d   :  { %96 = vst.msk [vmem:[%s3451_s3 + $0xb0] sm:$0xff] %vm41_vm1, %v1705_v44  ;;  %97 = vst.msk [vmem:[%s3451_s3 + $0xb8] sm:$0xff] %vm41_vm1, %v1705_v44 }
  0x3e   :  { %1627 = vmatmul.mubr.msk.bf16.gmra.mrb[12].mxu0 %vm242_vm0, %v1664_v52  ;;  %98 = vst.msk [vmem:[%s3451_s3 + $0xc0] sm:$0xff] %vm41_vm1, %v1705_v44  ;;  %99 = vst.msk [vmem:[%s3451_s3 + $0xc8] sm:$0xff] %vm41_vm1, %v1705_v44 }
  0x3f   :  { %1643 = vmatmul.mubr.msk.bf16.gmra.mrb[12].mxu1 %vm242_vm0, %v1664_v52  ;;  %363 = vmatprep.mubr.bf16.mxu0 %v1704_v0  ;;  %100 = vst.msk [vmem:[%s3451_s3 + $0xd0] sm:$0xff] %vm41_vm1, %v1705_v44  ;;  %101 = vst.msk [vmem:[%s3451_s3 + $0xd8] sm:$0xff] %vm41_vm1, %v1705_v44 }
  0x40   :  { %1030 = vmatprep.mubr.bf16.mxu1 %v1704_v0  ;;  %102 = vst.msk [vmem:[%s3451_s3 + $0xe0] sm:$0xff] %vm41_vm1, %v1705_v44  ;;  %103 = vst.msk [vmem:[%s3451_s3 + $0xe8] sm:$0xff] %vm41_vm1, %v1705_v44 }
  0x41   :  { %104 = vst.msk [vmem:[%s3451_s3 + $0xf0] sm:$0xff] %vm41_vm1, %v1705_v44  ;;  %105 = vst.msk [vmem:[%s3451_s3 + $0xf8] sm:$0xff] %vm41_vm1, %v1705_v44 }
  0x46   :  { %1628 = vmatmul.mubr.msk.bf16.gmra.mrb[16].mxu0 %vm242_vm0, %v1665_v53 }
  0x47   :  { %1644 = vmatmul.mubr.msk.bf16.gmra.mrb[16].mxu1 %vm242_vm0, %v1665_v53  ;;  %373 = vmatprep.mubr.bf16.mxu0 %v1704_v0 }
  0x48   :  { %1040 = vmatprep.mubr.bf16.mxu1 %v1704_v0 }
  0x4e   :  { %1629 = vmatmul.mubr.msk.bf16.gmra.mrb[20].mxu0 %vm242_vm0, %v1666_v54 }
  0x4f   :  { %1645 = vmatmul.mubr.msk.bf16.gmra.mrb[20].mxu1 %vm242_vm0, %v1666_v54  ;;  %383 = vmatprep.mubr.bf16.mxu0 %v1704_v0 }
  0x50   :  { %1050 = vmatprep.mubr.bf16.mxu1 %v1704_v0 }
  0x56   :  { %1630 = vmatmul.mubr.msk.bf16.gmra.mrb[24].mxu0 %vm242_vm0, %v1667_v55 }
  0x57   :  { %1646 = vmatmul.mubr.msk.bf16.gmra.mrb[24].mxu1 %vm242_vm0, %v1667_v55  ;;  %393 = vmatprep.mubr.bf16.mxu0 %v1704_v0 }
  0x58   :  { %1060 = vmatprep.mubr.bf16.mxu1 %v1704_v0 }
  0x5e   :  { %1631 = vmatmul.mubr.msk.bf16.gmra.mrb[28].mxu0 %vm242_vm0, %v1668_v56 }
  0x5f   :  { %1647 = vmatmul.mubr.msk.bf16.gmra.mrb[28].mxu1 %vm242_vm0, %v1668_v56  ;;  %403 = vmatprep.mubr.bf16.mxu0 %v1704_v0 }
  0x60   :  { %1070 = vmatprep.mubr.bf16.mxu1 %v1704_v0 }
  0x66   :  { %1632 = vmatmul.mubr.msk.bf16.gmra.mrb[32].mxu0 %vm242_vm0, %v1669_v57 }
  0x67   :  { %1648 = vmatmul.mubr.msk.bf16.gmra.mrb[32].mxu1 %vm242_vm0, %v1669_v57  ;;  %413 = vmatprep.mubr.bf16.mxu0 %v1704_v0 }
  0x68   :  { %1080 = vmatprep.mubr.bf16.mxu1 %v1704_v0 }
  0x6e   :  { %1633 = vmatmul.mubr.msk.bf16.gmra.mrb[36].mxu0 %vm242_vm0, %v1670_v58 }
  0x6f   :  { %1649 = vmatmul.mubr.msk.bf16.gmra.mrb[36].mxu1 %vm242_vm0, %v1670_v58  ;;  %423 = vmatprep.mubr.bf16.mxu0 %v1704_v0 }
  0x70   :  { %1090 = vmatprep.mubr.bf16.mxu1 %v1704_v0 }
  0x76   :  { %1634 = vmatmul.mubr.msk.bf16.gmra.mrb[40].mxu0 %vm242_vm0, %v1671_v59 }
  0x77   :  { %1650 = vmatmul.mubr.msk.bf16.gmra.mrb[40].mxu1 %vm242_vm0, %v1671_v59  ;;  %433 = vmatprep.mubr.bf16.mxu0 %v1704_v0 }
  0x78   :  { %1100 = vmatprep.mubr.bf16.mxu1 %v1704_v0 }
  0x7e   :  { %1635 = vmatmul.mubr.msk.bf16.gmra.mrb[44].mxu0 %vm242_vm0, %v1672_v60 }
  0x7f   :  { %1651 = vmatmul.mubr.msk.bf16.gmra.mrb[44].mxu1 %vm242_vm0, %v1672_v60  ;;  %443 = vmatprep.mubr.bf16.mxu0 %v1704_v0 }
  0x80   :  { %1110 = vmatprep.mubr.bf16.mxu1 %v1704_v0 }
  0x86   :  { %1636 = vmatmul.mubr.msk.bf16.gmra.mrb[48].mxu0 %vm242_vm0, %v1673_v61 }
  0x87   :  { %1652 = vmatmul.mubr.msk.bf16.gmra.mrb[48].mxu1 %vm242_vm0, %v1673_v61  ;;  %453 = vmatprep.mubr.bf16.mxu0 %v1704_v0 }
  0x88   :  { %1120 = vmatprep.mubr.bf16.mxu1 %v1704_v0 }
  0x8e   :  { %1637 = vmatmul.mubr.msk.bf16.gmra.mrb[52].mxu0 %vm242_vm0, %v1674_v62 }
  0x8f   :  { %1653 = vmatmul.mubr.msk.bf16.gmra.mrb[52].mxu1 %vm242_vm0, %v1674_v62  ;;  %463 = vmatprep.mubr.bf16.mxu0 %v1704_v0 }
  0x90   :  { %1130 = vmatprep.mubr.bf16.mxu1 %v1704_v0 }
  0x96   :  { %1638 = vmatmul.mubr.msk.bf16.gmra.mrb[56].mxu0 %vm242_vm0, %v1675_v63 }
  0x97   :  { %1654 = vmatmul.mubr.msk.bf16.gmra.mrb[56].mxu1 %vm242_vm0, %v1675_v63  ;;  %473 = vmatprep.mubr.bf16.mxu0 %v1704_v0 }
  0x98   :  { %1140 = vmatprep.mubr.bf16.mxu1 %v1704_v0 }
  0x9e   :  { %1639 = vmatmul.mubr.msk.bf16.gmra.mrb[60].mxu0 %vm242_vm0, %v1676_v1 }
  0x9f   :  { %1655 = vmatmul.mubr.msk.bf16.gmra.mrb[60].mxu1 %vm242_vm0, %v1676_v1 }
  0xf9   :  { %v325_v2 = vpop.f32.mrb[0].mxu0 }
  0xfa   :  { %v709_v3 = vmul.f32 %v325_v2, %v325_v2  ;;  %v992_v4 = vpop.f32.mrb[0].mxu1  ;;  %v327_v5 = vpop.f32.mrb[1].mxu0 }
  0xfb   :  { %v1375_v6 = vmul.f32 %v992_v4, %v992_v4  ;;  %v710_v7 = vmul.f32 %v327_v5, %v327_v5  ;;  %v994_v8 = vpop.f32.mrb[1].mxu1  ;;  %v329_v9 = vpop.f32.mrb[2].mxu0  ;;  %v516_v10 = vadd.f32 %v327_v5, %v325_v2 }
  0xfc   :  { %v1376_v11 = vmul.f32 %v994_v8, %v994_v8  ;;  %v711_v12 = vmul.f32 %v329_v9, %v329_v9  ;;  %v996_v0 = vpop.f32.mrb[2].mxu1  ;;  %v331_v13 = vpop.f32.mrb[3].mxu0  ;;  %v1183_v14 = vadd.f32 %v994_v8, %v992_v4 }
  0xfd   :  { %v1377_v15 = vmul.f32 %v996_v0, %v996_v0  ;;  %v712_v16 = vmul.f32 %v331_v13, %v331_v13  ;;  %v998_v17 = vpop.f32.mrb[3].mxu1  ;;  %517 = vadd.xlane.f32.xlu0 %v516_v10  ;;  %v519_v18 = vadd.f32 %v331_v13, %v329_v9  ;;  %v1850_v19 = vadd.f32 %v710_v7, %v709_v3 }
  0xfe   :  { %v1378_v20 = vmul.f32 %v998_v17, %v998_v17  ;;  %v1186_v21 = vadd.f32 %v998_v17, %v996_v0  ;;  %v1852_v22 = vadd.f32 %v1376_v11, %v1375_v6 }
  0xff   :  { %v776_v23 = vadd.f32 %v712_v16, %v711_v12 }
 0x100   :  { %1187 = vadd.xlane.f32.xlu1 %v1186_v21  ;;  %v1854_v24 = vadd.f32 %v1378_v20, %v1377_v15 }
 0x101   :  { %1184 = vadd.xlane.f32.xlu0 %v1183_v14  ;;  %v335_v25 = vpop.f32.mrb[4].mxu0 }
 0x102   :  { %v713_v26 = vmul.f32 %v335_v25, %v335_v25  ;;  %v337_v27 = vpop.f32.mrb[5].mxu0  ;;  %v1002_v28 = vpop.f32.mrb[4].mxu1 }
 0x103   :  { %v714_v29 = vmul.f32 %v337_v27, %v337_v27  ;;  %v339_v30 = vpop.f32.mrb[6].mxu0  ;;  %v1856_v31 = vmul.f32 %v1002_v28, %v1002_v28  ;;  %v1004_v32 = vpop.f32.mrb[5].mxu1  ;;  %v1858_v33 = vadd.f32 %v337_v27, %v335_v25 }
 0x104   :  { %777 = vadd.xlane.f32.xlu1 %v776_v23  ;;  %v1860_v34 = vmul.f32 %v339_v30, %v339_v30  ;;  %v341_v35 = vpop.f32.mrb[7].mxu0  ;;  %v1862_v36 = vmul.f32 %v1004_v32, %v1004_v32  ;;  %v1864_v37 = vpop.f32.mrb[6].mxu1  ;;  %v1866_v38 = vadd.f32 %v1004_v32, %v1002_v28 }
 0x105   :  { %520 = vadd.xlane.f32.xlu0 %v519_v18  ;;  %v1868_v39 = vmul.f32 %v341_v35, %v341_v35  ;;  %v1872_v40 = vmul.f32 %v1864_v37, %v1864_v37  ;;  %v1874_v41 = vpop.f32.mrb[7].mxu1  ;;  %v1876_v42 = vadd.f32 %v341_v35, %v339_v30  ;;  %v1878_v43 = vadd.f32 %v714_v29, %v713_v26 }
 0x106   :  { %v1382_v45 = vmul.f32 %v1874_v41, %v1874_v41  ;;  %v1192_v46 = vadd.f32 %v1874_v41, %v1864_v37  ;;  %v1445_v47 = vadd.f32 %v1862_v36, %v1856_v31 }
 0x107   :  { %v782_v48 = vadd.f32 %v1868_v39, %v1860_v34 }
 0x108   :  { %1443 = vadd.xlane.f32.xlu1 %v1854_v24  ;;  %v2210_v49 = vadd.f32 %v1382_v45, %v1872_v40 }
 0x109   :  { %774 = vadd.xlane.f32.xlu0 %v1850_v19  ;;  %v345_v50 = vpop.f32.mrb[8].mxu0 }
 0x10a   :  { %v717_v51 = vmul.f32 %v345_v50, %v345_v50  ;;  %v347_v52 = vpop.f32.mrb[9].mxu0  ;;  %v1012_v53 = vpop.f32.mrb[8].mxu1 }
 0x10b   :  { %v718_v54 = vmul.f32 %v347_v52, %v347_v52  ;;  %v349_v55 = vpop.f32.mrb[10].mxu0  ;;  %v1383_v56 = vmul.f32 %v1012_v53, %v1012_v53  ;;  %v1014_v57 = vpop.f32.mrb[9].mxu1  ;;  %v2213_v58 = vadd.f32 %v347_v52, %v345_v50 }
 0x10c   :  { %523 = vadd.xlane.f32.xlu1 %v1858_v33  ;;  %v719_v59 = vmul.f32 %v349_v55, %v349_v55  ;;  %v351_v60 = vpop.f32.mrb[11].mxu0  ;;  %v1384_v61 = vmul.f32 %v1014_v57, %v1014_v57  ;;  %v1016_v62 = vpop.f32.mrb[10].mxu1  ;;  %v2216_v63 = vadd.f32 %v1014_v57, %v1012_v53 }
 0x10d   :  { %1440 = vadd.xlane.f32.xlu0 %v1852_v22  ;;  %v720_v1 = vmul.f32 %v351_v60, %v351_v60  ;;  %v1385_v2 = vmul.f32 %v1016_v62, %v1016_v62  ;;  %v1018_v3 = vpop.f32.mrb[11].mxu1  ;;  %v531_v4 = vadd.f32 %v351_v60, %v349_v55  ;;  %v2219_v5 = vadd.f32 %v718_v54, %v717_v51 }
 0x10e   :  { %v1386_v6 = vmul.f32 %v1018_v3, %v1018_v3  ;;  %v2221_v7 = vadd.f32 %v1018_v3, %v1016_v62  ;;  %v2223_v8 = vadd.f32 %v1384_v61, %v1383_v56 }
 0x10f   :  { %v2225_v9 = vadd.f32 %v720_v1, %v719_v59 }
 0x110   :  { %526 = vadd.xlane.f32.xlu1 %v1876_v42  ;;  %v2228_v10 = vadd.f32 %v1386_v6, %v1385_v2 }
 0x111   :  { %1190 = vadd.xlane.f32.xlu0 %v1866_v38  ;;  %v355_v11 = vpop.f32.mrb[12].mxu0 }
 0x112   :  { %v721_v12 = vmul.f32 %v355_v11, %v355_v11  ;;  %v357_v0 = vpop.f32.mrb[13].mxu0  ;;  %v1022_v13 = vpop.f32.mrb[12].mxu1 }
 0x113   :  { %v722_v14 = vmul.f32 %v357_v0, %v357_v0  ;;  %v359_v15 = vpop.f32.mrb[14].mxu0  ;;  %v1387_v16 = vmul.f32 %v1022_v13, %v1022_v13  ;;  %v1024_v17 = vpop.f32.mrb[13].mxu1  ;;  %v2231_v18 = vadd.f32 %v357_v0, %v355_v11 }
 0x114   :  { %1193 = vadd.xlane.f32.xlu1 %v1192_v46  ;;  %v723_v19 = vmul.f32 %v359_v15, %v359_v15  ;;  %v361_v20 = vpop.f32.mrb[15].mxu0  ;;  %v1388_v21 = vmul.f32 %v1024_v17, %v1024_v17  ;;  %v1026_v22 = vpop.f32.mrb[14].mxu1  ;;  %v2233_v23 = vadd.f32 %v1024_v17, %v1022_v13 }
 0x115   :  { %780 = vadd.xlane.f32.xlu0 %v1878_v43  ;;  %v724_v24 = vmul.f32 %v361_v20, %v361_v20  ;;  %v1389_v25 = vmul.f32 %v1026_v22, %v1026_v22  ;;  %v1028_v26 = vpop.f32.mrb[15].mxu1  ;;  %v2236_v27 = vadd.f32 %v361_v20, %v359_v15  ;;  %v2238_v28 = vadd.f32 %v722_v14, %v721_v12 }
 0x116   :  { %v1390_v29 = vmul.f32 %v1028_v26, %v1028_v26  ;;  %v2240_v30 = vadd.f32 %v1028_v26, %v1026_v22  ;;  %v2242_v31 = vadd.f32 %v1388_v21, %v1387_v16 }
 0x117   :  { %v2244_v32 = vadd.f32 %v724_v24, %v723_v19 }
 0x118   :  { %783 = vadd.xlane.f32.xlu1 %v782_v48  ;;  %v2246_v33 = vadd.f32 %v1390_v29, %v1389_v25 }
 0x119   :  { %1446 = vadd.xlane.f32.xlu0 %v1445_v47  ;;  %v365_v34 = vpop.f32.mrb[16].mxu0 }
 0x11a   :  { %v725_v35 = vmul.f32 %v365_v34, %v365_v34  ;;  %v367_v36 = vpop.f32.mrb[17].mxu0  ;;  %v1032_v37 = vpop.f32.mrb[16].mxu1 }
 0x11b   :  { %v726_v38 = vmul.f32 %v367_v36, %v367_v36  ;;  %v369_v39 = vpop.f32.mrb[18].mxu0  ;;  %v1391_v40 = vmul.f32 %v1032_v37, %v1032_v37  ;;  %v1034_v41 = vpop.f32.mrb[17].mxu1  ;;  %v2248_v42 = vadd.f32 %v367_v36, %v365_v34 }
 0x11c   :  { %1449 = vadd.xlane.f32.xlu1 %v2210_v49  ;;  %v727_v43 = vmul.f32 %v369_v39, %v369_v39  ;;  %v371_v44 = vpop.f32.mrb[19].mxu0  ;;  %v1392_v45 = vmul.f32 %v1034_v41, %v1034_v41  ;;  %v1036_v46 = vpop.f32.mrb[18].mxu1  ;;  %v2251_v48 = vadd.f32 %v1034_v41, %v1032_v37 }
 0x11d   :  { %529 = vadd.xlane.f32.xlu0 %v2213_v58  ;;  %v728_v47 = vmul.f32 %v371_v44, %v371_v44  ;;  %v1393_v50 = vmul.f32 %v1036_v46, %v1036_v46  ;;  %v1038_v51 = vpop.f32.mrb[19].mxu1  ;;  %v2254_v52 = vadd.f32 %v371_v44, %v369_v39  ;;  %v2256_v53 = vadd.f32 %v726_v38, %v725_v35 }
 0x11e   :  { %v1394_v54 = vmul.f32 %v1038_v51, %v1038_v51  ;;  %v2258_v55 = vadd.f32 %v1038_v51, %v1036_v46  ;;  %v2260_v56 = vadd.f32 %v1392_v45, %v1391_v40 }
 0x11f   :  { %v2262_v49 = vadd.f32 %v728_v47, %v727_v43 }
 0x120   :  { %532 = vadd.xlane.f32.xlu1 %v531_v4  ;;  %v2264_v57 = vadd.f32 %v1394_v54, %v1393_v50 }
 0x121   :  { %1196 = vadd.xlane.f32.xlu0 %v2216_v63  ;;  %v375_v58 = vpop.f32.mrb[20].mxu0 }
 0x122   :  { %v729_v59 = vmul.f32 %v375_v58, %v375_v58  ;;  %v377_v60 = vpop.f32.mrb[21].mxu0  ;;  %v1042_v61 = vpop.f32.mrb[20].mxu1 }
 0x123   :  { %v730_v62 = vmul.f32 %v377_v60, %v377_v60  ;;  %v379_v1 = vpop.f32.mrb[22].mxu0  ;;  %v1395_v2 = vmul.f32 %v1042_v61, %v1042_v61  ;;  %v1044_v3 = vpop.f32.mrb[21].mxu1  ;;  %v2267_v6 = vadd.f32 %v377_v60, %v375_v58 }
 0x124   :  { %1199 = vadd.xlane.f32.xlu1 %v2221_v7  ;;  %v731_v11 = vmul.f32 %v379_v1, %v379_v1  ;;  %v381_v12 = vpop.f32.mrb[23].mxu0  ;;  %v1396_v0 = vmul.f32 %v1044_v3, %v1044_v3  ;;  %v1046_v4 = vpop.f32.mrb[22].mxu1  ;;  %v2270_v13 = vadd.f32 %v1044_v3, %v1042_v61 }
 0x125   :  { %786 = vadd.xlane.f32.xlu0 %v2219_v5  ;;  %v732_v63 = vmul.f32 %v381_v12, %v381_v12  ;;  %v1397_v14 = vmul.f32 %v1046_v4, %v1046_v4  ;;  %v1048_v15 = vpop.f32.mrb[23].mxu1  ;;  %v2273_v16 = vadd.f32 %v381_v12, %v379_v1  ;;  %v2275_v17 = vadd.f32 %v730_v62, %v729_v59 }
 0x126   :  { %v1398_v19 = vmul.f32 %v1048_v15, %v1048_v15  ;;  %v2277_v20 = vadd.f32 %v1048_v15, %v1046_v4  ;;  %v2279_v21 = vadd.f32 %v1396_v0, %v1395_v2 }
 0x127   :  { %v2281_v7 = vadd.f32 %v732_v63, %v731_v11 }
 0x128   :  { %789 = vadd.xlane.f32.xlu1 %v2225_v9  ;;  %v2284_v22 = vadd.f32 %v1398_v19, %v1397_v14 }
 0x129   :  { %1452 = vadd.xlane.f32.xlu0 %v2223_v8  ;;  %v385_v5 = vpop.f32.mrb[24].mxu0 }
 0x12a   :  { %v733_v24 = vmul.f32 %v385_v5, %v385_v5  ;;  %v387_v25 = vpop.f32.mrb[25].mxu0  ;;  %v1052_v26 = vpop.f32.mrb[24].mxu1 }
 0x12b   :  { %v734_v29 = vmul.f32 %v387_v25, %v387_v25  ;;  %v389_v34 = vpop.f32.mrb[26].mxu0  ;;  %v1399_v35 = vmul.f32 %v1052_v26, %v1052_v26  ;;  %v1054_v36 = vpop.f32.mrb[25].mxu1  ;;  %v2287_v37 = vadd.f32 %v387_v25, %v385_v5 }
 0x12c   :  { %1455 = vadd.xlane.f32.xlu1 %v2228_v10  ;;  %v735_v38 = vmul.f32 %v389_v34, %v389_v34  ;;  %v391_v39 = vpop.f32.mrb[27].mxu0  ;;  %v1400_v40 = vmul.f32 %v1054_v36, %v1054_v36  ;;  %v1056_v9 = vpop.f32.mrb[26].mxu1  ;;  %v2290_v41 = vadd.f32 %v1054_v36, %v1052_v26 }
 0x12d   :  { %535 = vadd.xlane.f32.xlu0 %v2231_v18  ;;  %v736_v8 = vmul.f32 %v391_v39, %v391_v39  ;;  %v1401_v43 = vmul.f32 %v1056_v9, %v1056_v9  ;;  %v1058_v44 = vpop.f32.mrb[27].mxu1  ;;  %v2293_v45 = vadd.f32 %v391_v39, %v389_v34  ;;  %v2295_v46 = vadd.f32 %v734_v29, %v733_v24 }
 0x12e   :  { %v1402_v47 = vmul.f32 %v1058_v44, %v1058_v44  ;;  %v2297_v50 = vadd.f32 %v1058_v44, %v1056_v9  ;;  %v2299_v51 = vadd.f32 %v1400_v40, %v1399_v35 }
 0x12f   :  { %v2301_v10 = vadd.f32 %v736_v8, %v735_v38 }
 0x130   :  { %538 = vadd.xlane.f32.xlu1 %v2236_v27  ;;  %v2304_v54 = vadd.f32 %v1402_v47, %v1401_v43 }
 0x131   :  { %1202 = vadd.xlane.f32.xlu0 %v2233_v23  ;;  %v395_v18 = vpop.f32.mrb[28].mxu0 }
 0x132   :  { %v737_v58 = vmul.f32 %v395_v18, %v395_v18  ;;  %v397_v59 = vpop.f32.mrb[29].mxu0  ;;  %v1062_v60 = vpop.f32.mrb[28].mxu1 }
 0x133   :  { %v738_v61 = vmul.f32 %v397_v59, %v397_v59  ;;  %v399_v62 = vpop.f32.mrb[30].mxu0  ;;  %v1403_v1 = vmul.f32 %v1062_v60, %v1062_v60  ;;  %v1064_v2 = vpop.f32.mrb[29].mxu1  ;;  %v2307_v3 = vadd.f32 %v397_v59, %v395_v18 }
 0x134   :  { %1205 = vadd.xlane.f32.xlu1 %v2240_v30  ;;  %v739_v11 = vmul.f32 %v399_v62, %v399_v62  ;;  %v401_v12 = vpop.f32.mrb[31].mxu0  ;;  %v1404_v0 = vmul.f32 %v1064_v2, %v1064_v2  ;;  %v1066_v27 = vpop.f32.mrb[30].mxu1  ;;  %v2310_v4 = vadd.f32 %v1064_v2, %v1062_v60 }
 0x135   :  { %792 = vadd.xlane.f32.xlu0 %v2238_v28  ;;  %v740_v23 = vmul.f32 %v401_v12, %v401_v12  ;;  %v1405_v63 = vmul.f32 %v1066_v27, %v1066_v27  ;;  %v1068_v14 = vpop.f32.mrb[31].mxu1  ;;  %v2313_v15 = vadd.f32 %v401_v12, %v399_v62  ;;  %v2315_v19 = vadd.f32 %v738_v61, %v737_v58 }
 0x136   :  { %v1406_v5 = vmul.f32 %v1068_v14, %v1068_v14  ;;  %v2317_v24 = vadd.f32 %v1068_v14, %v1066_v27  ;;  %v2319_v25 = vadd.f32 %v1404_v0, %v1403_v1 }
 0x137   :  { %v2321_v30 = vadd.f32 %v740_v23, %v739_v11 }
 0x138   :  { %795 = vadd.xlane.f32.xlu1 %v2244_v32  ;;  %v2324_v26 = vadd.f32 %v1406_v5, %v1405_v63 }
 0x139   :  { %1458 = vadd.xlane.f32.xlu0 %v2242_v31  ;;  %v405_v28 = vpop.f32.mrb[32].mxu0 }
 0x13a   :  { %v741_v29 = vmul.f32 %v405_v28, %v405_v28  ;;  %v407_v34 = vpop.f32.mrb[33].mxu0  ;;  %v1072_v35 = vpop.f32.mrb[32].mxu1 }
 0x13b   :  { %v742_v36 = vmul.f32 %v407_v34, %v407_v34  ;;  %v409_v38 = vpop.f32.mrb[34].mxu0  ;;  %v1407_v39 = vmul.f32 %v1072_v35, %v1072_v35  ;;  %v1074_v40 = vpop.f32.mrb[33].mxu1  ;;  %v2327_v9 = vadd.f32 %v407_v34, %v405_v28 }
 0x13c   :  { %1461 = vadd.xlane.f32.xlu1 %v2246_v33  ;;  %v743_v8 = vmul.f32 %v409_v38, %v409_v38  ;;  %v411_v43 = vpop.f32.mrb[35].mxu0  ;;  %v1408_v44 = vmul.f32 %v1074_v40, %v1074_v40  ;;  %v1076_v32 = vpop.f32.mrb[34].mxu1  ;;  %v2330_v47 = vadd.f32 %v1074_v40, %v1072_v35 }
 0x13d   :  { %541 = vadd.xlane.f32.xlu0 %v2248_v42  ;;  %v744_v31 = vmul.f32 %v411_v43, %v411_v43  ;;  %v1409_v18 = vmul.f32 %v1076_v32, %v1076_v32  ;;  %v1078_v58 = vpop.f32.mrb[35].mxu1  ;;  %v2333_v59 = vadd.f32 %v411_v43, %v409_v38  ;;  %v2335_v60 = vadd.f32 %v742_v36, %v741_v29 }
 0x13e   :  { %v1410_v61 = vmul.f32 %v1078_v58, %v1078_v58  ;;  %v2337_v62 = vadd.f32 %v1078_v58, %v1076_v32  ;;  %v2339_v1 = vadd.f32 %v1408_v44, %v1407_v39 }
 0x13f   :  { %v2341_v33 = vadd.f32 %v744_v31, %v743_v8 }
 0x140   :  { %544 = vadd.xlane.f32.xlu1 %v2254_v52  ;;  %v2344_v2 = vadd.f32 %v1410_v61, %v1409_v18 }
 0x141   :  { %1208 = vadd.xlane.f32.xlu0 %v2251_v48  ;;  %v415_v42 = vpop.f32.mrb[36].mxu0 }
 0x142   :  { %v745_v11 = vmul.f32 %v415_v42, %v415_v42  ;;  %v417_v12 = vpop.f32.mrb[37].mxu0  ;;  %v1082_v0 = vpop.f32.mrb[36].mxu1 }
 0x143   :  { %v746_v27 = vmul.f32 %v417_v12, %v417_v12  ;;  %v419_v23 = vpop.f32.mrb[38].mxu0  ;;  %v1411_v63 = vmul.f32 %v1082_v0, %v1082_v0  ;;  %v1084_v14 = vpop.f32.mrb[37].mxu1  ;;  %v2347_v5 = vadd.f32 %v417_v12, %v415_v42 }
 0x144   :  { %1211 = vadd.xlane.f32.xlu1 %v2258_v55  ;;  %v747_v28 = vmul.f32 %v419_v23, %v419_v23  ;;  %v421_v29 = vpop.f32.mrb[39].mxu0  ;;  %v1412_v34 = vmul.f32 %v1084_v14, %v1084_v14  ;;  %v1086_v52 = vpop.f32.mrb[38].mxu1  ;;  %v2350_v35 = vadd.f32 %v1084_v14, %v1082_v0 }
 0x145   :  { %798 = vadd.xlane.f32.xlu0 %v2256_v53  ;;  %v748_v48 = vmul.f32 %v421_v29, %v421_v29  ;;  %v1413_v36 = vmul.f32 %v1086_v52, %v1086_v52  ;;  %v1088_v38 = vpop.f32.mrb[39].mxu1  ;;  %v2353_v39 = vadd.f32 %v421_v29, %v419_v23  ;;  %v2355_v40 = vadd.f32 %v746_v27, %v745_v11 }
 0x146   :  { %v1414_v8 = vmul.f32 %v1088_v38, %v1088_v38  ;;  %v2357_v43 = vadd.f32 %v1088_v38, %v1086_v52  ;;  %v2359_v44 = vadd.f32 %v1412_v34, %v1411_v63 }
 0x147   :  { %v2361_v55 = vadd.f32 %v748_v48, %v747_v28 }
 0x148   :  { %801 = vadd.xlane.f32.xlu1 %v2262_v49  ;;  %v2364_v32 = vadd.f32 %v1414_v8, %v1413_v36 }
 0x149   :  { %1464 = vadd.xlane.f32.xlu0 %v2260_v56  ;;  %v425_v53 = vpop.f32.mrb[40].mxu0 }
 0x14a   :  { %v749_v31 = vmul.f32 %v425_v53, %v425_v53  ;;  %v427_v18 = vpop.f32.mrb[41].mxu0  ;;  %v1092_v58 = vpop.f32.mrb[40].mxu1 }
 0x14b   :  { %v750_v61 = vmul.f32 %v427_v18, %v427_v18  ;;  %v429_v42 = vpop.f32.mrb[42].mxu0  ;;  %v1415_v11 = vmul.f32 %v1092_v58, %v1092_v58  ;;  %v1094_v12 = vpop.f32.mrb[41].mxu1  ;;  %v2367_v0 = vadd.f32 %v427_v18, %v425_v53 }
 0x14c   :  { %1467 = vadd.xlane.f32.xlu1 %v2264_v57  ;;  %v751_v27 = vmul.f32 %v429_v42, %v429_v42  ;;  %v431_v23 = vpop.f32.mrb[43].mxu0  ;;  %v1416_v63 = vmul.f32 %v1094_v12, %v1094_v12  ;;  %v1096_v49 = vpop.f32.mrb[42].mxu1  ;;  %v2370_v14 = vadd.f32 %v1094_v12, %v1092_v58 }
 0x14d   :  { %547 = vadd.xlane.f32.xlu0 %v2267_v6  ;;  %v752_v56 = vmul.f32 %v431_v23, %v431_v23  ;;  %v1417_v28 = vmul.f32 %v1096_v49, %v1096_v49  ;;  %v1098_v29 = vpop.f32.mrb[43].mxu1  ;;  %v2373_v34 = vadd.f32 %v431_v23, %v429_v42  ;;  %v2375_v52 = vadd.f32 %v750_v61, %v749_v31 }
 0x14e   :  { %v1418_v48 = vmul.f32 %v1098_v29, %v1098_v29  ;;  %v2377_v36 = vadd.f32 %v1098_v29, %v1096_v49  ;;  %v2379_v38 = vadd.f32 %v1416_v63, %v1415_v11 }
 0x14f   :  { %v2381_v57 = vadd.f32 %v752_v56, %v751_v27 }
 0x150   :  { %550 = vadd.xlane.f32.xlu1 %v2273_v16  ;;  %v2384_v8 = vadd.f32 %v1418_v48, %v1417_v28 }
 0x151   :  { %1214 = vadd.xlane.f32.xlu0 %v2270_v13  ;;  %v435_v6 = vpop.f32.mrb[44].mxu0 }
 0x152   :  { %3452 = vst [vmem:[#allocation5_spill] sm:$0xff] %v2384_v8  ;;  %v753_v53 = vmul.f32 %v435_v6, %v435_v6  ;;  %v437_v18 = vpop.f32.mrb[45].mxu0  ;;  %v1102_v58 = vpop.f32.mrb[44].mxu1 }
 0x153   :  { %v754_v42 = vmul.f32 %v437_v18, %v437_v18  ;;  %v439_v31 = vpop.f32.mrb[46].mxu0  ;;  %v1419_v61 = vmul.f32 %v1102_v58, %v1102_v58  ;;  %v1104_v12 = vpop.f32.mrb[45].mxu1  ;;  %v2387_v23 = vadd.f32 %v437_v18, %v435_v6 }
 0x154   :  { %1217 = vadd.xlane.f32.xlu1 %v2277_v20  ;;  %v755_v11 = vmul.f32 %v439_v31, %v439_v31  ;;  %v441_v27 = vpop.f32.mrb[47].mxu0  ;;  %v1420_v63 = vmul.f32 %v1104_v12, %v1104_v12  ;;  %v1106_v16 = vpop.f32.mrb[46].mxu1  ;;  %v2390_v49 = vadd.f32 %v1104_v12, %v1102_v58 }
 0x155   :  { %804 = vadd.xlane.f32.xlu0 %v2275_v17  ;;  %v756_v13 = vmul.f32 %v441_v27, %v441_v27  ;;  %v1421_v56 = vmul.f32 %v1106_v16, %v1106_v16  ;;  %v1108_v28 = vpop.f32.mrb[47].mxu1  ;;  %v2393_v29 = vadd.f32 %v441_v27, %v439_v31  ;;  %v2395_v48 = vadd.f32 %v754_v42, %v753_v53 }
 0x156   :  { %3453 = vst [vmem:[#allocation6_spill] sm:$0xff] %v2390_v49  ;;  %v1422_v8 = vmul.f32 %v1108_v28, %v1108_v28  ;;  %v2397_v6 = vadd.f32 %v1108_v28, %v1106_v16  ;;  %v2399_v18 = vadd.f32 %v1420_v63, %v1419_v61 }
 0x157   :  { %3454 = vst [vmem:[#allocation7_spill] sm:$0xff] %v2395_v48  ;;  %v2401_v20 = vadd.f32 %v756_v13, %v755_v11 }
 0x158   :  { %3455 = vst [vmem:[#allocation8_spill] sm:$0xff] %v2399_v18  ;;  %807 = vadd.xlane.f32.xlu1 %v2281_v7  ;;  %v2404_v58 = vadd.f32 %v1422_v8, %v1421_v56 }
 0x159   :  { %1470 = vadd.xlane.f32.xlu0 %v2279_v21  ;;  %v445_v17 = vpop.f32.mrb[48].mxu0 }
 0x15a   :  { %3456 = vst [vmem:[#allocation9_spill] sm:$0xff] %v2404_v58  ;;  %v757_v12 = vmul.f32 %v445_v17, %v445_v17  ;;  %v447_v49 = vpop.f32.mrb[49].mxu0  ;;  %v1112_v31 = vpop.f32.mrb[48].mxu1 }
 0x15b   :  { %v758_v27 = vmul.f32 %v447_v49, %v447_v49  ;;  %v449_v53 = vpop.f32.mrb[50].mxu0  ;;  %v1423_v42 = vmul.f32 %v1112_v31, %v1112_v31  ;;  %v1114_v48 = vpop.f32.mrb[49].mxu1  ;;  %v2407_v16 = vadd.f32 %v447_v49, %v445_v17 }
 0x15c   :  { %1473 = vadd.xlane.f32.xlu1 %v2284_v22  ;;  %v759_v61 = vmul.f32 %v449_v53, %v449_v53  ;;  %v451_v11 = vpop.f32.mrb[51].mxu0  ;;  %v2410_v63 = vadd.f32 %v1114_v48, %v1112_v31  ;;  %v1424_v7 = vmul.f32 %v1114_v48, %v1114_v48  ;;  %v1116_v8 = vpop.f32.mrb[50].mxu1 }
 0x15d   :  { %553 = vadd.xlane.f32.xlu0 %v2287_v37  ;;  %v2413_v21 = vadd.f32 %v758_v27, %v757_v12  ;;  %v760_v13 = vmul.f32 %v451_v11, %v451_v11  ;;  %v1425_v56 = vmul.f32 %v1116_v8, %v1116_v8  ;;  %v1118_v28 = vpop.f32.mrb[51].mxu1  ;;  %v2415_v58 = vadd.f32 %v451_v11, %v449_v53 }
 0x15e   :  { %v2417_v18 = vadd.f32 %v1424_v7, %v1423_v42  ;;  %v2419_v49 = vadd.f32 %v1118_v28, %v1116_v8  ;;  %v1426_v22 = vmul.f32 %v1118_v28, %v1118_v28 }
 0x15f   :  { %3457 = vst [vmem:[#allocation10_spill] sm:$0xff] %v2413_v21  ;;  %v2421_v17 = vadd.f32 %v760_v13, %v759_v61 }
 0x160   :  { %3458 = vst [vmem:[#allocation11_spill] sm:$0xff] %v2417_v18  ;;  %556 = vadd.xlane.f32.xlu1 %v2293_v45  ;;  %v2424_v48 = vadd.f32 %v1426_v22, %v1425_v56 }
 0x161   :  { %1220 = vadd.xlane.f32.xlu0 %v2290_v41  ;;  %v455_v37 = vpop.f32.mrb[52].mxu0 }
 0x162   :  { %3459 = vst [vmem:[#allocation12_spill] sm:$0xff] %v2424_v48  ;;  %v761_v12 = vmul.f32 %v455_v37, %v455_v37  ;;  %v457_v31 = vpop.f32.mrb[53].mxu0  ;;  %v1122_v27 = vpop.f32.mrb[52].mxu1 }
 0x163   :  { %v2427_v21 = vadd.f32 %v457_v31, %v455_v37  ;;  %v762_v53 = vmul.f32 %v457_v31, %v457_v31  ;;  %v459_v42 = vpop.f32.mrb[54].mxu0  ;;  %v1427_v11 = vmul.f32 %v1122_v27, %v1122_v27  ;;  %v1124_v7 = vpop.f32.mrb[53].mxu1 }
 0x164   :  { %1223 = vadd.xlane.f32.xlu1 %v2297_v50  ;;  %v763_v61 = vmul.f32 %v459_v42, %v459_v42  ;;  %v461_v8 = vpop.f32.mrb[55].mxu0  ;;  %v2430_v13 = vadd.f32 %v1124_v7, %v1122_v27  ;;  %v1428_v45 = vmul.f32 %v1124_v7, %v1124_v7  ;;  %v1126_v56 = vpop.f32.mrb[54].mxu1 }
 0x165   :  { %3460 = vst [vmem:[#allocation13_spill] sm:$0xff] %v2427_v21  ;;  %810 = vadd.xlane.f32.xlu0 %v2295_v46  ;;  %v2433_v41 = vadd.f32 %v762_v53, %v761_v12  ;;  %v2435_v28 = vadd.f32 %v461_v8, %v459_v42  ;;  %v764_v22 = vmul.f32 %v461_v8, %v461_v8  ;;  %v1128_v31 = vpop.f32.mrb[55].mxu1 }
 0x166   :  { %v1429_v37 = vmul.f32 %v1126_v56, %v1126_v56  ;;  %v2437_v21 = vadd.f32 %v1428_v45, %v1427_v11  ;;  %v2439_v48 = vadd.f32 %v1128_v31, %v1126_v56  ;;  %v1430_v50 = vmul.f32 %v1128_v31, %v1128_v31 }
 0x167   :  { %v2441_v18 = vadd.f32 %v764_v22, %v763_v61 }
 0x168   :  { %3461 = vst [vmem:[#allocation14_spill] sm:$0xff] %v2437_v21  ;;  %813 = vadd.xlane.f32.xlu1 %v2301_v10  ;;  %v2444_v27 = vadd.f32 %v1430_v50, %v1429_v37 }
 0x169   :  { %3462 = vst [vmem:[#allocation15_spill] sm:$0xff] %v2441_v18  ;;  %1476 = vadd.xlane.f32.xlu0 %v2299_v51  ;;  %v465_v46 = vpop.f32.mrb[56].mxu0 }
 0x16a   :  { %3463 = vst [vmem:[#allocation16_spill] sm:$0xff] %v2444_v27  ;;  %v765_v12 = vmul.f32 %v465_v46, %v465_v46  ;;  %v467_v53 = vpop.f32.mrb[57].mxu0  ;;  %v1132_v42 = vpop.f32.mrb[56].mxu1 }
 0x16b   :  { %v2447_v7 = vadd.f32 %v467_v53, %v465_v46  ;;  %v766_v8 = vmul.f32 %v467_v53, %v467_v53  ;;  %v469_v11 = vpop.f32.mrb[58].mxu0  ;;  %v1431_v45 = vmul.f32 %v1132_v42, %v1132_v42  ;;  %v1134_v56 = vpop.f32.mrb[57].mxu1 }
 0x16c   :  { %1479 = vadd.xlane.f32.xlu1 %v2304_v54  ;;  %v767_v61 = vmul.f32 %v469_v11, %v469_v11  ;;  %v471_v22 = vpop.f32.mrb[59].mxu0  ;;  %v2450_v31 = vadd.f32 %v1134_v56, %v1132_v42  ;;  %v1432_v10 = vmul.f32 %v1134_v56, %v1134_v56  ;;  %v1136_v37 = vpop.f32.mrb[58].mxu1 }
 0x16d   :  { %3464 = vst [vmem:[#allocation17_spill] sm:$0xff] %v2447_v7  ;;  %559 = vadd.xlane.f32.xlu0 %v2307_v3  ;;  %v2453_v51 = vadd.f32 %v766_v8, %v765_v12  ;;  %v2455_v50 = vadd.f32 %v471_v22, %v469_v11  ;;  %v768_v46 = vmul.f32 %v471_v22, %v471_v22  ;;  %v1138_v53 = vpop.f32.mrb[59].mxu1 }
 0x16e   :  { %v1433_v27 = vmul.f32 %v1136_v37, %v1136_v37  ;;  %v2457_v21 = vadd.f32 %v1432_v10, %v1431_v45  ;;  %v2459_v7 = vadd.f32 %v1138_v53, %v1136_v37  ;;  %v1434_v54 = vmul.f32 %v1138_v53, %v1138_v53 }
 0x16f   :  { %v2461_v18 = vadd.f32 %v768_v46, %v767_v61 }
 0x170   :  { %3465 = vst [vmem:[#allocation18_spill] sm:$0xff] %v2457_v21  ;;  %562 = vadd.xlane.f32.xlu1 %v2313_v15  ;;  %v2464_v42 = vadd.f32 %v1434_v54, %v1433_v27 }
 0x171   :  { %3466 = vst [vmem:[#allocation19_spill] sm:$0xff] %v2461_v18  ;;  %1226 = vadd.xlane.f32.xlu0 %v2310_v4  ;;  %v475_v3 = vpop.f32.mrb[60].mxu0 }
 0x172   :  { %3467 = vst [vmem:[#allocation20_spill] sm:$0xff] %v2464_v42  ;;  %v769_v12 = vmul.f32 %v475_v3, %v475_v3  ;;  %v477_v8 = vpop.f32.mrb[61].mxu0  ;;  %v1142_v11 = vpop.f32.mrb[60].mxu1 }
 0x173   :  { %v2467_v56 = vadd.f32 %v477_v8, %v475_v3  ;;  %v770_v22 = vmul.f32 %v477_v8, %v477_v8  ;;  %v479_v45 = vpop.f32.mrb[62].mxu0  ;;  %v1435_v10 = vmul.f32 %v1142_v11, %v1142_v11  ;;  %v1144_v37 = vpop.f32.mrb[61].mxu1 }
 0x174   :  { %1229 = vadd.xlane.f32.xlu1 %v2317_v24  ;;  %v771_v61 = vmul.f32 %v479_v45, %v479_v45  ;;  %v481_v46 = vpop.f32.mrb[63].mxu0  ;;  %v2470_v53 = vadd.f32 %v1144_v37, %v1142_v11  ;;  %v1436_v15 = vmul.f32 %v1144_v37, %v1144_v37  ;;  %v1146_v27 = vpop.f32.mrb[62].mxu1  ;;  %v487_v37 = vld [vmem:[%s3450_s2 + $0x18] sm:$0xff] }
 0x175   :  { %3468 = vst [vmem:[#allocation21_spill] sm:$0xff] %v2467_v56  ;;  %816 = vadd.xlane.f32.xlu0 %v2315_v19  ;;  %v2473_v4 = vadd.f32 %v770_v22, %v769_v12  ;;  %v2475_v54 = vadd.f32 %v481_v46, %v479_v45  ;;  %v772_v3 = vmul.f32 %v481_v46, %v481_v46  ;;  %v1148_v8 = vpop.f32.mrb[63].mxu1  ;;  %v484_v19 = vld [vmem:[%s3450_s2] sm:$0xff]  ;;  %v486_v12 = vld [vmem:[%s3450_s2 + $0x10] sm:$0xff] }
 0x176   :  { %v1437_v42 = vmul.f32 %v1146_v27, %v1146_v27  ;;  %v2477_v21 = vadd.f32 %v1436_v15, %v1435_v10  ;;  %v2479_v56 = vadd.f32 %v1148_v8, %v1146_v27  ;;  %v1438_v24 = vmul.f32 %v1148_v8, %v1148_v8 }
 0x177   :  { %v2481_v18 = vadd.f32 %v772_v3, %v771_v61 }
 0x178   :  { %819 = vadd.xlane.f32.xlu1 %v2321_v30  ;;  %v2484_v11 = vadd.f32 %v1438_v24, %v1437_v42 }
 0x179   :  { %1482 = vadd.xlane.f32.xlu0 %v2319_v25 }
 0x17c   :  { %1485 = vadd.xlane.f32.xlu1 %v2324_v26 }
 0x17d   :  { %565 = vadd.xlane.f32.xlu0 %v2327_v9 }
 0x180   :  { %568 = vadd.xlane.f32.xlu1 %v2333_v59  ;;  %v485_v59 = vld [vmem:[%s3450_s2 + $0x8] sm:$0xff] }
 0x181   :  { %1232 = vadd.xlane.f32.xlu0 %v2330_v47  ;;  %v678_v47 = vld [vmem:[%s3451_s3 + $0x8] sm:$0xff] }
 0x184   :  { %1235 = vadd.xlane.f32.xlu1 %v2337_v62 }
 0x185   :  { %822 = vadd.xlane.f32.xlu0 %v2335_v60 }
 0x188   :  { %825 = vadd.xlane.f32.xlu1 %v2341_v33 }
 0x189   :  { %1488 = vadd.xlane.f32.xlu0 %v2339_v1 }
 0x18a   :  { %v518_v25 = vpop.xlane.xlu0 %517 }
 0x18b   :  { %v612_v30 = vadd.f32 %v518_v25, %v484_v19 }
 0x18c   :  { %1491 = vadd.xlane.f32.xlu1 %v2344_v2 }
 0x18d   :  { %645 = vst.msk [vmem:[%s3450_s2] sm:$0xff] %vm41_vm1, %v612_v30  ;;  %v1188_v26 = vpop.xlane.xlu1 %1187  ;;  %571 = vadd.xlane.f32.xlu0 %v2347_v5  ;;  %v677_v5 = vld [vmem:[%s3451_s3] sm:$0xff] }
 0x18e   :  { %v1185_v9 = vpop.xlane.xlu0 %1184 }
 0x190   :  { %574 = vadd.xlane.f32.xlu1 %v2353_v39 }
 0x191   :  { %v778_v60 = vpop.xlane.xlu1 %777  ;;  %1238 = vadd.xlane.f32.xlu0 %v2350_v35 }
 0x192   :  { %v870_v62 = vadd.f32 %v778_v60, %v678_v47  ;;  %v521_v1 = vpop.xlane.xlu0 %520 }
 0x193   :  { %v613_v33 = vadd.f32 %v521_v1, %v485_v59  ;;  %v489_v1 = vld [vmem:[%s3450_s2 + $0x28] sm:$0xff] }
 0x194   :  { %v1151_v2 = vld [vmem:[%s3450_s2] sm:$0xff]  ;;  %902 = vst.msk [vmem:[%s3451_s3 + $0x8] sm:$0xff] %vm41_vm1, %v870_v62  ;;  %1241 = vadd.xlane.f32.xlu1 %v2357_v43 }
 0x195   :  { %v1279_v39 = vadd.f32 %v1185_v9, %v1151_v2  ;;  %646 = vst.msk [vmem:[%s3450_s2 + $0x8] sm:$0xff] %vm41_vm1, %v613_v33  ;;  %v1444_v35 = vpop.xlane.xlu1 %1443  ;;  %828 = vadd.xlane.f32.xlu0 %v2355_v40  ;;  %v3469_v33 = vld [vmem:[#allocation5_spill] sm:$0xff] }
 0x196   :  { %v775_v42 = vpop.xlane.xlu0 %774 }
 0x197   :  { %1311 = vst.msk [vmem:[%s3450_s2] sm:$0xff] %vm41_vm1, %v1279_v39  ;;  %v869_v43 = vadd.f32 %v775_v42, %v677_v5 }
 0x198   :  { %831 = vadd.xlane.f32.xlu1 %v2361_v55 }
 0x199   :  { %901 = vst.msk [vmem:[%s3451_s3] sm:$0xff] %vm41_vm1, %v869_v43  ;;  %v524_v22 = vpop.xlane.xlu1 %523  ;;  %1494 = vadd.xlane.f32.xlu0 %v2359_v44 }
 0x19a   :  { %v614_v40 = vadd.f32 %v524_v22, %v486_v12  ;;  %v1441_v45 = vpop.xlane.xlu0 %1440  ;;  %v3470_v12 = vld [vmem:[#allocation6_spill] sm:$0xff] }
 0x19b   :  { %v1344_v10 = vld [vmem:[%s3451_s3 + $0x8] sm:$0xff] }
 0x19c   :  { %v1152_v55 = vld [vmem:[%s3450_s2 + $0x8] sm:$0xff]  ;;  %v1536_v61 = vadd.f32 %v1444_v35, %v1344_v10  ;;  %647 = vst.msk [vmem:[%s3450_s2 + $0x10] sm:$0xff] %vm41_vm1, %v614_v40  ;;  %1497 = vadd.xlane.f32.xlu1 %v2364_v32 }
 0x19d   :  { %v1280_v44 = vadd.f32 %v1188_v26, %v1152_v55  ;;  %v527_v46 = vpop.xlane.xlu1 %526  ;;  %577 = vadd.xlane.f32.xlu0 %v2367_v0  ;;  %v679_v0 = vld [vmem:[%s3451_s3 + $0x10] sm:$0xff] }
 0x19e   :  { %1568 = vst.msk [vmem:[%s3451_s3 + $0x8] sm:$0xff] %vm41_vm1, %v1536_v61  ;;  %v615_v15 = vadd.f32 %v527_v46, %v487_v37  ;;  %v1191_v27 = vpop.xlane.xlu0 %1190  ;;  %v3471_v55 = vld [vmem:[#allocation7_spill] sm:$0xff] }
 0x19f   :  { %1312 = vst.msk [vmem:[%s3450_s2 + $0x8] sm:$0xff] %vm41_vm1, %v1280_v44 }
 0x1a0   :  { %v1343_v32 = vld [vmem:[%s3451_s3] sm:$0xff]  ;;  %648 = vst.msk [vmem:[%s3450_s2 + $0x18] sm:$0xff] %vm41_vm1, %v615_v15  ;;  %580 = vadd.xlane.f32.xlu1 %v2373_v34  ;;  %v680_v34 = vld [vmem:[%s3451_s3 + $0x18] sm:$0xff]  ;;  %v490_v15 = vld [vmem:[%s3450_s2 + $0x30] sm:$0xff] }
 0x1a1   :  { %v1535_v3 = vadd.f32 %v1441_v45, %v1343_v32  ;;  %v1194_v8 = vpop.xlane.xlu1 %1193  ;;  %1244 = vadd.xlane.f32.xlu0 %v2370_v14  ;;  %v682_v45 = vld [vmem:[%s3451_s3 + $0x28] sm:$0xff]  ;;  %v3472_v32 = vld [vmem:[#allocation8_spill] sm:$0xff] }
 0x1a2   :  { %v781_v24 = vpop.xlane.xlu0 %780 }
 0x1a3   :  { %1567 = vst.msk [vmem:[%s3451_s3] sm:$0xff] %vm41_vm1, %v1535_v3  ;;  %v1153_v19 = vld [vmem:[%s3450_s2 + $0x10] sm:$0xff]  ;;  %v871_v25 = vadd.f32 %v781_v24, %v679_v0  ;;  %v3473_v24 = vld [vmem:[#allocation9_spill] sm:$0xff] }
 0x1a4   :  { %v1281_v30 = vadd.f32 %v1191_v27, %v1153_v19  ;;  %1247 = vadd.xlane.f32.xlu1 %v2377_v36 }
 0x1a5   :  { %903 = vst.msk [vmem:[%s3451_s3 + $0x10] sm:$0xff] %vm41_vm1, %v871_v25  ;;  %v784_v14 = vpop.xlane.xlu1 %783  ;;  %834 = vadd.xlane.f32.xlu0 %v2375_v52  ;;  %v488_v52 = vld [vmem:[%s3450_s2 + $0x20] sm:$0xff] }
 0x1a6   :  { %1313 = vst.msk [vmem:[%s3450_s2 + $0x10] sm:$0xff] %vm41_vm1, %v1281_v30  ;;  %v872_v26 = vadd.f32 %v784_v14, %v680_v34  ;;  %v1447_v9 = vpop.xlane.xlu0 %1446 }
 0x1a7   :  { %v1154_v47 = vld [vmem:[%s3450_s2 + $0x18] sm:$0xff] }
 0x1a8   :  { %v1282_v36 = vadd.f32 %v1194_v8, %v1154_v47  ;;  %904 = vst.msk [vmem:[%s3451_s3 + $0x18] sm:$0xff] %vm41_vm1, %v872_v26  ;;  %837 = vadd.xlane.f32.xlu1 %v2381_v57  ;;  %v491_v8 = vld [vmem:[%s3450_s2 + $0x38] sm:$0xff] }
 0x1a9   :  { %v1450_v59 = vpop.xlane.xlu1 %1449  ;;  %1500 = vadd.xlane.f32.xlu0 %v2379_v38 }
 0x1aa   :  { %1314 = vst.msk [vmem:[%s3450_s2 + $0x18] sm:$0xff] %vm41_vm1, %v1282_v36  ;;  %v530_v60 = vpop.xlane.xlu0 %529 }
 0x1ab   :  { %v616_v62 = vadd.f32 %v530_v60, %v488_v52  ;;  %v684_v52 = vld [vmem:[%s3451_s3 + $0x38] sm:$0xff]  ;;  %v3474_v60 = vld [vmem:[#allocation10_spill] sm:$0xff] }
 0x1ac   :  { %v1345_v57 = vld [vmem:[%s3451_s3 + $0x10] sm:$0xff]  ;;  %1503 = vadd.xlane.f32.xlu1 %v3469_v33  ;;  %v492_v33 = vld [vmem:[%s3450_s2 + $0x40] sm:$0xff] }
 0x1ad   :  { %v1537_v2 = vadd.f32 %v1447_v9, %v1345_v57  ;;  %649 = vst.msk [vmem:[%s3450_s2 + $0x20] sm:$0xff] %vm41_vm1, %v616_v62  ;;  %v533_v38 = vpop.xlane.xlu1 %532  ;;  %583 = vadd.xlane.f32.xlu0 %v2387_v23  ;;  %v681_v23 = vld [vmem:[%s3451_s3 + $0x20] sm:$0xff] }
 0x1ae   :  { %v617_v5 = vadd.f32 %v533_v38, %v489_v1  ;;  %v1197_v39 = vpop.xlane.xlu0 %1196  ;;  %v3475_v38 = vld [vmem:[#allocation11_spill] sm:$0xff] }
 0x1af   :  { %1569 = vst.msk [vmem:[%s3451_s3 + $0x10] sm:$0xff] %vm41_vm1, %v1537_v2  ;;  %v1346_v35 = vld [vmem:[%s3451_s3 + $0x18] sm:$0xff] }
 0x1b0   :  { %v1538_v42 = vadd.f32 %v1450_v59, %v1346_v35  ;;  %650 = vst.msk [vmem:[%s3450_s2 + $0x28] sm:$0xff] %vm41_vm1, %v617_v5  ;;  %586 = vadd.xlane.f32.xlu1 %v2393_v29  ;;  %v493_v35 = vld [vmem:[%s3450_s2 + $0x48] sm:$0xff] }
 0x1b1   :  { %v1200_v43 = vpop.xlane.xlu1 %1199  ;;  %1250 = vadd.xlane.f32.xlu0 %v3470_v12  ;;  %v3477_v12 = vld [vmem:[#allocation13_spill] sm:$0xff] }
 0x1b2   :  { %1570 = vst.msk [vmem:[%s3451_s3 + $0x18] sm:$0xff] %vm41_vm1, %v1538_v42  ;;  %v787_v22 = vpop.xlane.xlu0 %786  ;;  %v3476_v42 = vld [vmem:[#allocation12_spill] sm:$0xff] }
 0x1b3   :  { %v873_v40 = vadd.f32 %v787_v22, %v681_v23 }
 0x1b4   :  { %v1155_v29 = vld [vmem:[%s3450_s2 + $0x20] sm:$0xff]  ;;  %1253 = vadd.xlane.f32.xlu1 %v2397_v6 }
 0x1b5   :  { %v1283_v10 = vadd.f32 %v1197_v39, %v1155_v29  ;;  %905 = vst.msk [vmem:[%s3451_s3 + $0x20] sm:$0xff] %vm41_vm1, %v873_v40  ;;  %v790_v37 = vpop.xlane.xlu1 %789  ;;  %840 = vadd.xlane.f32.xlu0 %v3471_v55 }
 0x1b6   :  { %v874_v61 = vadd.f32 %v790_v37, %v682_v45  ;;  %v1453_v44 = vpop.xlane.xlu0 %1452 }
 0x1b7   :  { %1315 = vst.msk [vmem:[%s3450_s2 + $0x20] sm:$0xff] %vm41_vm1, %v1283_v10  ;;  %v1156_v6 = vld [vmem:[%s3450_s2 + $0x28] sm:$0xff]  ;;  %v685_v10 = vld [vmem:[%s3451_s3 + $0x40] sm:$0xff] }
 0x1b8   :  { %v1284_v46 = vadd.f32 %v1200_v43, %v1156_v6  ;;  %906 = vst.msk [vmem:[%s3451_s3 + $0x28] sm:$0xff] %vm41_vm1, %v874_v61  ;;  %843 = vadd.xlane.f32.xlu1 %v2401_v20 }
 0x1b9   :  { %v1456_v27 = vpop.xlane.xlu1 %1455  ;;  %1506 = vadd.xlane.f32.xlu0 %v3472_v32  ;;  %v3478_v32 = vld [vmem:[#allocation15_spill] sm:$0xff] }
 0x1ba   :  { %1316 = vst.msk [vmem:[%s3450_s2 + $0x28] sm:$0xff] %vm41_vm1, %v1284_v46  ;;  %v536_v0 = vpop.xlane.xlu0 %535 }
 0x1bb   :  { %v618_v3 = vadd.f32 %v536_v0, %v490_v15 }
 0x1bc   :  { %v1347_v20 = vld [vmem:[%s3451_s3 + $0x20] sm:$0xff]  ;;  %1509 = vadd.xlane.f32.xlu1 %v3473_v24  ;;  %v495_v24 = vld [vmem:[%s3450_s2 + $0x58] sm:$0xff] }
 0x1bd   :  { %v1539_v19 = vadd.f32 %v1453_v44, %v1347_v20  ;;  %651 = vst.msk [vmem:[%s3450_s2 + $0x30] sm:$0xff] %vm41_vm1, %v618_v3  ;;  %v539_v25 = vpop.xlane.xlu1 %538  ;;  %589 = vadd.xlane.f32.xlu0 %v2407_v16  ;;  %v683_v16 = vld [vmem:[%s3451_s3 + $0x30] sm:$0xff]  ;;  %v686_v44 = vld [vmem:[%s3451_s3 + $0x48] sm:$0xff]  ;;  %v3479_v3 = vld [vmem:[#allocation17_spill] sm:$0xff] }
 0x1be   :  { %v619_v34 = vadd.f32 %v539_v25, %v491_v8  ;;  %v1203_v30 = vpop.xlane.xlu0 %1202 }
 0x1bf   :  { %1571 = vst.msk [vmem:[%s3451_s3 + $0x20] sm:$0xff] %vm41_vm1, %v1539_v19  ;;  %v1348_v14 = vld [vmem:[%s3451_s3 + $0x28] sm:$0xff] }
 0x1c0   :  { %v1540_v26 = vadd.f32 %v1456_v27, %v1348_v14  ;;  %652 = vst.msk [vmem:[%s3450_s2 + $0x38] sm:$0xff] %vm41_vm1, %v619_v34  ;;  %592 = vadd.xlane.f32.xlu1 %v2415_v58 }
 0x1c1   :  { %v1206_v9 = vpop.xlane.xlu1 %1205  ;;  %1256 = vadd.xlane.f32.xlu0 %v2410_v63 }
 0x1c2   :  { %1572 = vst.msk [vmem:[%s3451_s3 + $0x28] sm:$0xff] %vm41_vm1, %v1540_v26  ;;  %v793_v47 = vpop.xlane.xlu0 %792 }
 0x1c3   :  { %v875_v36 = vadd.f32 %v793_v47, %v683_v16 }
 0x1c4   :  { %v1157_v58 = vld [vmem:[%s3450_s2 + $0x30] sm:$0xff]  ;;  %1259 = vadd.xlane.f32.xlu1 %v2419_v49 }
 0x1c5   :  { %v1285_v59 = vadd.f32 %v1203_v30, %v1157_v58  ;;  %907 = vst.msk [vmem:[%s3451_s3 + $0x30] sm:$0xff] %vm41_vm1, %v875_v36  ;;  %v796_v63 = vpop.xlane.xlu1 %795  ;;  %846 = vadd.xlane.f32.xlu0 %v3474_v60  ;;  %v688_v36 = vld [vmem:[%s3451_s3 + $0x58] sm:$0xff] }
 0x1c6   :  { %v876_v62 = vadd.f32 %v796_v63, %v684_v52  ;;  %v1459_v1 = vpop.xlane.xlu0 %1458  ;;  %v3480_v52 = vld [vmem:[#allocation19_spill] sm:$0xff] }
 0x1c7   :  { %1317 = vst.msk [vmem:[%s3450_s2 + $0x30] sm:$0xff] %vm41_vm1, %v1285_v59  ;;  %v1158_v49 = vld [vmem:[%s3450_s2 + $0x38] sm:$0xff]  ;;  %v3481_v59 = vld [vmem:[#allocation21_spill] sm:$0xff] }
 0x1c8   :  { %v1286_v57 = vadd.f32 %v1206_v9, %v1158_v49  ;;  %908 = vst.msk [vmem:[%s3451_s3 + $0x38] sm:$0xff] %vm41_vm1, %v876_v62  ;;  %849 = vadd.xlane.f32.xlu1 %v2421_v17  ;;  %v496_v49 = vld [vmem:[%s3450_s2 + $0x60] sm:$0xff] }
 0x1c9   :  { %v1462_v2 = vpop.xlane.xlu1 %1461  ;;  %1512 = vadd.xlane.f32.xlu0 %v3475_v38  ;;  %v497_v38 = vld [vmem:[%s3450_s2 + $0x68] sm:$0xff] }
 0x1ca   :  { %1318 = vst.msk [vmem:[%s3450_s2 + $0x38] sm:$0xff] %vm41_vm1, %v1286_v57  ;;  %v542_v5 = vpop.xlane.xlu0 %541 }
 0x1cb   :  { %v620_v39 = vadd.f32 %v542_v5, %v492_v33 }
 0x1cc   :  { %v1349_v17 = vld [vmem:[%s3451_s3 + $0x30] sm:$0xff]  ;;  %1515 = vadd.xlane.f32.xlu1 %v3476_v42 }
 0x1cd   :  { %v1541_v23 = vadd.f32 %v1459_v1, %v1349_v17  ;;  %653 = vst.msk [vmem:[%s3450_s2 + $0x40] sm:$0xff] %vm41_vm1, %v620_v39  ;;  %v545_v43 = vpop.xlane.xlu1 %544  ;;  %595 = vadd.xlane.f32.xlu0 %v3477_v12 }
 0x1ce   :  { %v621_v22 = vadd.f32 %v545_v43, %v493_v35  ;;  %v1209_v40 = vpop.xlane.xlu0 %1208 }
 0x1cf   :  { %1573 = vst.msk [vmem:[%s3451_s3 + $0x30] sm:$0xff] %vm41_vm1, %v1541_v23  ;;  %v1350_v45 = vld [vmem:[%s3451_s3 + $0x38] sm:$0xff]  ;;  %v3482_v23 = vld [vmem:[#allocation14_spill] sm:$0xff] }
 0x1d0   :  { %v1542_v29 = vadd.f32 %v1462_v2, %v1350_v45  ;;  %654 = vst.msk [vmem:[%s3450_s2 + $0x48] sm:$0xff] %vm41_vm1, %v621_v22  ;;  %598 = vadd.xlane.f32.xlu1 %v2435_v28  ;;  %v690_v22 = vld [vmem:[%s3451_s3 + $0x68] sm:$0xff] }
 0x1d1   :  { %v1212_v37 = vpop.xlane.xlu1 %1211  ;;  %1262 = vadd.xlane.f32.xlu0 %v2430_v13 }
 0x1d2   :  { %1574 = vst.msk [vmem:[%s3451_s3 + $0x38] sm:$0xff] %vm41_vm1, %v1542_v29  ;;  %v799_v55 = vpop.xlane.xlu0 %798 }
 0x1d3   :  { %v877_v61 = vadd.f32 %v799_v55, %v685_v10  ;;  %v3484_v10 = vld [vmem:[#allocation18_spill] sm:$0xff] }
 0x1d4   :  { %v1159_v28 = vld [vmem:[%s3450_s2 + $0x40] sm:$0xff]  ;;  %1265 = vadd.xlane.f32.xlu1 %v2439_v48 }
 0x1d5   :  { %v1287_v6 = vadd.f32 %v1209_v40, %v1159_v28  ;;  %909 = vst.msk [vmem:[%s3451_s3 + $0x40] sm:$0xff] %vm41_vm1, %v877_v61  ;;  %v802_v13 = vpop.xlane.xlu1 %801  ;;  %852 = vadd.xlane.f32.xlu0 %v2433_v41  ;;  %v494_v41 = vld [vmem:[%s3450_s2 + $0x50] sm:$0xff]  ;;  %v3483_v40 = vld [vmem:[#allocation16_spill] sm:$0xff] }
 0x1d6   :  { %v878_v46 = vadd.f32 %v802_v13, %v686_v44  ;;  %v1465_v15 = vpop.xlane.xlu0 %1464  ;;  %v3485_v28 = vld [vmem:[#allocation20_spill] sm:$0xff] }
 0x1d7   :  { %1319 = vst.msk [vmem:[%s3450_s2 + $0x40] sm:$0xff] %vm41_vm1, %v1287_v6  ;;  %v1160_v48 = vld [vmem:[%s3450_s2 + $0x48] sm:$0xff]  ;;  %v498_v6 = vld [vmem:[%s3450_s2 + $0x70] sm:$0xff] }
 0x1d8   :  { %v1288_v27 = vadd.f32 %v1212_v37, %v1160_v48  ;;  %910 = vst.msk [vmem:[%s3451_s3 + $0x48] sm:$0xff] %vm41_vm1, %v878_v46  ;;  %855 = vadd.xlane.f32.xlu1 %v3478_v32  ;;  %v499_v48 = vld [vmem:[%s3450_s2 + $0x78] sm:$0xff] }
 0x1d9   :  { %v1468_v0 = vpop.xlane.xlu1 %1467  ;;  %601 = vadd.xlane.f32.xlu0 %v3479_v3 }
 0x1da   :  { %1320 = vst.msk [vmem:[%s3450_s2 + $0x48] sm:$0xff] %vm41_vm1, %v1288_v27  ;;  %v548_v8 = vpop.xlane.xlu0 %547 }
 0x1db   :  { %v622_v20 = vadd.f32 %v548_v8, %v494_v41 }
 0x1dc   :  { %v1351_v19 = vld [vmem:[%s3451_s3 + $0x40] sm:$0xff]  ;;  %604 = vadd.xlane.f32.xlu1 %v2455_v50 }
 0x1dd   :  { %v1543_v25 = vadd.f32 %v1465_v15, %v1351_v19  ;;  %655 = vst.msk [vmem:[%s3450_s2 + $0x50] sm:$0xff] %vm41_vm1, %v622_v20  ;;  %v551_v34 = vpop.xlane.xlu1 %550  ;;  %1268 = vadd.xlane.f32.xlu0 %v2450_v31  ;;  %v687_v31 = vld [vmem:[%s3451_s3 + $0x50] sm:$0xff] }
 0x1de   :  { %v623_v30 = vadd.f32 %v551_v34, %v495_v24  ;;  %v1215_v14 = vpop.xlane.xlu0 %1214 }
 0x1df   :  { %1575 = vst.msk [vmem:[%s3451_s3 + $0x40] sm:$0xff] %vm41_vm1, %v1543_v25  ;;  %v1352_v50 = vld [vmem:[%s3451_s3 + $0x48] sm:$0xff]  ;;  %v692_v25 = vld [vmem:[%s3451_s3 + $0x78] sm:$0xff] }
 0x1e0   :  { %v1544_v26 = vadd.f32 %v1468_v0, %v1352_v50  ;;  %656 = vst.msk [vmem:[%s3450_s2 + $0x58] sm:$0xff] %vm41_vm1, %v623_v30  ;;  %1271 = vadd.xlane.f32.xlu1 %v2459_v7 }
 0x1e1   :  { %v1218_v16 = vpop.xlane.xlu1 %1217  ;;  %858 = vadd.xlane.f32.xlu0 %v2453_v51 }
 0x1e2   :  { %1576 = vst.msk [vmem:[%s3451_s3 + $0x48] sm:$0xff] %vm41_vm1, %v1544_v26  ;;  %v805_v9 = vpop.xlane.xlu0 %804 }
 0x1e3   :  { %v879_v47 = vadd.f32 %v805_v9, %v687_v31  ;;  %v500_v9 = vld [vmem:[%s3450_s2 + $0x80] sm:$0xff] }
 0x1e4   :  { %v1161_v7 = vld [vmem:[%s3450_s2 + $0x50] sm:$0xff]  ;;  %861 = vadd.xlane.f32.xlu1 %v3480_v52  ;;  %v501_v52 = vld [vmem:[%s3450_s2 + $0x88] sm:$0xff] }
 0x1e5   :  { %v1289_v58 = vadd.f32 %v1215_v14, %v1161_v7  ;;  %911 = vst.msk [vmem:[%s3451_s3 + $0x50] sm:$0xff] %vm41_vm1, %v879_v47  ;;  %v808_v51 = vpop.xlane.xlu1 %807  ;;  %607 = vadd.xlane.f32.xlu0 %v3481_v59 }
 0x1e6   :  { %v880_v63 = vadd.f32 %v808_v51, %v688_v36  ;;  %v1471_v60 = vpop.xlane.xlu0 %1470 }
 0x1e7   :  { %1321 = vst.msk [vmem:[%s3450_s2 + $0x50] sm:$0xff] %vm41_vm1, %v1289_v58  ;;  %v1162_v62 = vld [vmem:[%s3450_s2 + $0x58] sm:$0xff] }
 0x1e8   :  { %v1290_v1 = vadd.f32 %v1218_v16, %v1162_v62  ;;  %912 = vst.msk [vmem:[%s3451_s3 + $0x58] sm:$0xff] %vm41_vm1, %v880_v63  ;;  %610 = vadd.xlane.f32.xlu1 %v2475_v54 }
 0x1e9   :  { %v1474_v57 = vpop.xlane.xlu1 %1473  ;;  %1274 = vadd.xlane.f32.xlu0 %v2470_v53 }
 0x1ea   :  { %1322 = vst.msk [vmem:[%s3450_s2 + $0x58] sm:$0xff] %vm41_vm1, %v1290_v1  ;;  %v554_v33 = vpop.xlane.xlu0 %553 }
 0x1eb   :  { %v624_v2 = vadd.f32 %v554_v33, %v496_v49  ;;  %v693_v49 = vld [vmem:[%s3451_s3 + $0x80] sm:$0xff] }
 0x1ec   :  { %v1353_v54 = vld [vmem:[%s3451_s3 + $0x50] sm:$0xff]  ;;  %1277 = vadd.xlane.f32.xlu1 %v2479_v56 }
 0x1ed   :  { %v1545_v5 = vadd.f32 %v1471_v60, %v1353_v54  ;;  %657 = vst.msk [vmem:[%s3450_s2 + $0x60] sm:$0xff] %vm41_vm1, %v624_v2  ;;  %v557_v53 = vpop.xlane.xlu1 %556  ;;  %864 = vadd.xlane.f32.xlu0 %v2473_v4  ;;  %v689_v4 = vld [vmem:[%s3451_s3 + $0x60] sm:$0xff] }
 0x1ee   :  { %v625_v39 = vadd.f32 %v557_v53, %v497_v38  ;;  %v1221_v35 = vpop.xlane.xlu0 %1220  ;;  %v694_v38 = vld [vmem:[%s3451_s3 + $0x88] sm:$0xff] }
 0x1ef   :  { %1577 = vst.msk [vmem:[%s3451_s3 + $0x50] sm:$0xff] %vm41_vm1, %v1545_v5  ;;  %v1354_v56 = vld [vmem:[%s3451_s3 + $0x58] sm:$0xff] }
 0x1f0   :  { %v1546_v17 = vadd.f32 %v1474_v57, %v1354_v56  ;;  %658 = vst.msk [vmem:[%s3450_s2 + $0x68] sm:$0xff] %vm41_vm1, %v625_v39  ;;  %867 = vadd.xlane.f32.xlu1 %v2481_v18 }
 0x1f1   :  { %v1224_v42 = vpop.xlane.xlu1 %1223  ;;  %1518 = vadd.xlane.f32.xlu0 %v3482_v23 }
 0x1f2   :  { %1578 = vst.msk [vmem:[%s3451_s3 + $0x58] sm:$0xff] %vm41_vm1, %v1546_v17  ;;  %v811_v43 = vpop.xlane.xlu0 %810 }
 0x1f3   :  { %v881_v12 = vadd.f32 %v811_v43, %v689_v4  ;;  %v502_v4 = vld [vmem:[%s3450_s2 + $0x90] sm:$0xff] }
 0x1f4   :  { %v1163_v18 = vld [vmem:[%s3450_s2 + $0x60] sm:$0xff]  ;;  %1521 = vadd.xlane.f32.xlu1 %v3483_v40 }
 0x1f5   :  { %v1291_v45 = vadd.f32 %v1221_v35, %v1163_v18  ;;  %913 = vst.msk [vmem:[%s3451_s3 + $0x60] sm:$0xff] %vm41_vm1, %v881_v12  ;;  %v814_v29 = vpop.xlane.xlu1 %813  ;;  %1524 = vadd.xlane.f32.xlu0 %v3484_v10  ;;  %v503_v12 = vld [vmem:[%s3450_s2 + $0x98] sm:$0xff] }
 0x1f6   :  { %v882_v37 = vadd.f32 %v814_v29, %v690_v22  ;;  %v1477_v55 = vpop.xlane.xlu0 %1476 }
 0x1f7   :  { %1323 = vst.msk [vmem:[%s3450_s2 + $0x60] sm:$0xff] %vm41_vm1, %v1291_v45  ;;  %v1164_v61 = vld [vmem:[%s3450_s2 + $0x68] sm:$0xff] }
 0x1f8   :  { %v1292_v44 = vadd.f32 %v1224_v42, %v1164_v61  ;;  %914 = vst.msk [vmem:[%s3451_s3 + $0x68] sm:$0xff] %vm41_vm1, %v882_v37  ;;  %1527 = vadd.xlane.f32.xlu1 %v3485_v28 }
 0x1f9   :  { %v1480_v13 = vpop.xlane.xlu1 %1479  ;;  %1530 = vadd.xlane.f32.xlu0 %v2477_v21 }
 0x1fa   :  { %1324 = vst.msk [vmem:[%s3450_s2 + $0x68] sm:$0xff] %vm41_vm1, %v1292_v44  ;;  %v560_v46 = vpop.xlane.xlu0 %559 }
 0x1fb   :  { %v626_v15 = vadd.f32 %v560_v46, %v498_v6  ;;  %v696_v6 = vld [vmem:[%s3451_s3 + $0x98] sm:$0xff] }
 0x1fc   :  { %v1355_v27 = vld [vmem:[%s3451_s3 + $0x60] sm:$0xff]  ;;  %1533 = vadd.xlane.f32.xlu1 %v2484_v11  ;;  %v691_v11 = vld [vmem:[%s3451_s3 + $0x70] sm:$0xff] }
 0x1fd   :  { %v1547_v32 = vadd.f32 %v1477_v55, %v1355_v27  ;;  %659 = vst.msk [vmem:[%s3450_s2 + $0x70] sm:$0xff] %vm41_vm1, %v626_v15  ;;  %v563_v21 = vpop.xlane.xlu1 %562  ;;  %v695_v55 = vld [vmem:[%s3451_s3 + $0x90] sm:$0xff] }
 0x1fe   :  { %v627_v41 = vadd.f32 %v563_v21, %v499_v48  ;;  %v1227_v0 = vpop.xlane.xlu0 %1226 }
 0x1ff   :  { %1579 = vst.msk [vmem:[%s3451_s3 + $0x60] sm:$0xff] %vm41_vm1, %v1547_v32  ;;  %v1356_v3 = vld [vmem:[%s3451_s3 + $0x68] sm:$0xff] }
 0x200   :  { %v1548_v8 = vadd.f32 %v1480_v13, %v1356_v3  ;;  %660 = vst.msk [vmem:[%s3450_s2 + $0x78] sm:$0xff] %vm41_vm1, %v627_v41  ;;  %v504_v41 = vld [vmem:[%s3450_s2 + $0xa0] sm:$0xff] }
 0x201   :  { %v1230_v20 = vpop.xlane.xlu1 %1229 }
 0x202   :  { %1580 = vst.msk [vmem:[%s3451_s3 + $0x68] sm:$0xff] %vm41_vm1, %v1548_v8  ;;  %v817_v24 = vpop.xlane.xlu0 %816 }
 0x203   :  { %v883_v19 = vadd.f32 %v817_v24, %v691_v11  ;;  %v505_v11 = vld [vmem:[%s3450_s2 + $0xa8] sm:$0xff] }
 0x204   :  { %v1165_v34 = vld [vmem:[%s3450_s2 + $0x70] sm:$0xff] }
 0x205   :  { %v1293_v30 = vadd.f32 %v1227_v0, %v1165_v34  ;;  %915 = vst.msk [vmem:[%s3451_s3 + $0x70] sm:$0xff] %vm41_vm1, %v883_v19  ;;  %v820_v14 = vpop.xlane.xlu1 %819 }
 0x206   :  { %v884_v50 = vadd.f32 %v820_v14, %v692_v25  ;;  %v1483_v26 = vpop.xlane.xlu0 %1482 }
 0x207   :  { %1325 = vst.msk [vmem:[%s3450_s2 + $0x70] sm:$0xff] %vm41_vm1, %v1293_v30  ;;  %v1166_v31 = vld [vmem:[%s3450_s2 + $0x78] sm:$0xff] }
 0x208   :  { %v1294_v16 = vadd.f32 %v1230_v20, %v1166_v31  ;;  %916 = vst.msk [vmem:[%s3451_s3 + $0x78] sm:$0xff] %vm41_vm1, %v884_v50  ;;  %v697_v50 = vld [vmem:[%s3451_s3 + $0xa0] sm:$0xff] }
 0x209   :  { %v1486_v47 = vpop.xlane.xlu1 %1485 }
 0x20a   :  { %1326 = vst.msk [vmem:[%s3450_s2 + $0x78] sm:$0xff] %vm41_vm1, %v1294_v16  ;;  %v566_v36 = vpop.xlane.xlu0 %565 }
 0x20b   :  { %v628_v7 = vadd.f32 %v566_v36, %v500_v9  ;;  %v698_v9 = vld [vmem:[%s3451_s3 + $0xa8] sm:$0xff] }
 0x20c   :  { %v1357_v58 = vld [vmem:[%s3451_s3 + $0x70] sm:$0xff] }
 0x20d   :  { %v1549_v51 = vadd.f32 %v1483_v26, %v1357_v58  ;;  %661 = vst.msk [vmem:[%s3450_s2 + $0x80] sm:$0xff] %vm41_vm1, %v628_v7  ;;  %v569_v59 = vpop.xlane.xlu1 %568 }
 0x20e   :  { %v629_v63 = vadd.f32 %v569_v59, %v501_v52  ;;  %v1233_v60 = vpop.xlane.xlu0 %1232 }
 0x20f   :  { %1581 = vst.msk [vmem:[%s3451_s3 + $0x70] sm:$0xff] %vm41_vm1, %v1549_v51  ;;  %v1358_v62 = vld [vmem:[%s3451_s3 + $0x78] sm:$0xff] }
 0x210   :  { %v1550_v1 = vadd.f32 %v1486_v47, %v1358_v62  ;;  %662 = vst.msk [vmem:[%s3450_s2 + $0x88] sm:$0xff] %vm41_vm1, %v629_v63  ;;  %v506_v63 = vld [vmem:[%s3450_s2 + $0xb0] sm:$0xff] }
 0x211   :  { %v1236_v57 = vpop.xlane.xlu1 %1235 }
 0x212   :  { %1582 = vst.msk [vmem:[%s3451_s3 + $0x78] sm:$0xff] %vm41_vm1, %v1550_v1  ;;  %v823_v33 = vpop.xlane.xlu0 %822 }
 0x213   :  { %v885_v2 = vadd.f32 %v823_v33, %v693_v49  ;;  %v507_v49 = vld [vmem:[%s3450_s2 + $0xb8] sm:$0xff] }
 0x214   :  { %v1167_v54 = vld [vmem:[%s3450_s2 + $0x80] sm:$0xff] }
 0x215   :  { %v1295_v5 = vadd.f32 %v1233_v60, %v1167_v54  ;;  %917 = vst.msk [vmem:[%s3451_s3 + $0x80] sm:$0xff] %vm41_vm1, %v885_v2  ;;  %v826_v53 = vpop.xlane.xlu1 %825 }
 0x216   :  { %v886_v39 = vadd.f32 %v826_v53, %v694_v38  ;;  %v1489_v35 = vpop.xlane.xlu0 %1488 }
 0x217   :  { %1327 = vst.msk [vmem:[%s3450_s2 + $0x80] sm:$0xff] %vm41_vm1, %v1295_v5  ;;  %v1168_v56 = vld [vmem:[%s3450_s2 + $0x88] sm:$0xff] }
 0x218   :  { %v1296_v17 = vadd.f32 %v1236_v57, %v1168_v56  ;;  %918 = vst.msk [vmem:[%s3451_s3 + $0x88] sm:$0xff] %vm41_vm1, %v886_v39  ;;  %v699_v39 = vld [vmem:[%s3451_s3 + $0xb0] sm:$0xff] }
 0x219   :  { %v1492_v42 = vpop.xlane.xlu1 %1491 }
 0x21a   :  { %1328 = vst.msk [vmem:[%s3450_s2 + $0x88] sm:$0xff] %vm41_vm1, %v1296_v17  ;;  %v572_v23 = vpop.xlane.xlu0 %571 }
 0x21b   :  { %v630_v43 = vadd.f32 %v572_v23, %v502_v4  ;;  %v700_v4 = vld [vmem:[%s3451_s3 + $0xb8] sm:$0xff] }
 0x21c   :  { %v1359_v22 = vld [vmem:[%s3451_s3 + $0x80] sm:$0xff] }
 0x21d   :  { %v1551_v18 = vadd.f32 %v1489_v35, %v1359_v22  ;;  %663 = vst.msk [vmem:[%s3450_s2 + $0x90] sm:$0xff] %vm41_vm1, %v630_v43  ;;  %v575_v40 = vpop.xlane.xlu1 %574 }
 0x21e   :  { %v631_v45 = vadd.f32 %v575_v40, %v503_v12  ;;  %v1239_v29 = vpop.xlane.xlu0 %1238 }
 0x21f   :  { %1583 = vst.msk [vmem:[%s3451_s3 + $0x80] sm:$0xff] %vm41_vm1, %v1551_v18  ;;  %v1360_v10 = vld [vmem:[%s3451_s3 + $0x88] sm:$0xff] }
 0x220   :  { %v1552_v37 = vadd.f32 %v1492_v42, %v1360_v10  ;;  %664 = vst.msk [vmem:[%s3450_s2 + $0x98] sm:$0xff] %vm41_vm1, %v631_v45  ;;  %v508_v45 = vld [vmem:[%s3450_s2 + $0xc0] sm:$0xff] }
 0x221   :  { %v1242_v61 = vpop.xlane.xlu1 %1241 }
 0x222   :  { %1584 = vst.msk [vmem:[%s3451_s3 + $0x88] sm:$0xff] %vm41_vm1, %v1552_v37  ;;  %v829_v44 = vpop.xlane.xlu0 %828 }
 0x223   :  { %v887_v28 = vadd.f32 %v829_v44, %v695_v55  ;;  %v509_v55 = vld [vmem:[%s3450_s2 + $0xc8] sm:$0xff] }
 0x224   :  { %v1169_v13 = vld [vmem:[%s3450_s2 + $0x90] sm:$0xff] }
 0x225   :  { %v1297_v46 = vadd.f32 %v1239_v29, %v1169_v13  ;;  %919 = vst.msk [vmem:[%s3451_s3 + $0x90] sm:$0xff] %vm41_vm1, %v887_v28  ;;  %v832_v15 = vpop.xlane.xlu1 %831 }
 0x226   :  { %v888_v48 = vadd.f32 %v832_v15, %v696_v6  ;;  %v1495_v27 = vpop.xlane.xlu0 %1494 }
 0x227   :  { %1329 = vst.msk [vmem:[%s3450_s2 + $0x90] sm:$0xff] %vm41_vm1, %v1297_v46  ;;  %v1170_v32 = vld [vmem:[%s3450_s2 + $0x98] sm:$0xff] }
 0x228   :  { %v1298_v21 = vadd.f32 %v1242_v61, %v1170_v32  ;;  %920 = vst.msk [vmem:[%s3451_s3 + $0x98] sm:$0xff] %vm41_vm1, %v888_v48  ;;  %v701_v48 = vld [vmem:[%s3451_s3 + $0xc0] sm:$0xff] }
 0x229   :  { %v1498_v0 = vpop.xlane.xlu1 %1497 }
 0x22a   :  { %1330 = vst.msk [vmem:[%s3450_s2 + $0x98] sm:$0xff] %vm41_vm1, %v1298_v21  ;;  %v578_v3 = vpop.xlane.xlu0 %577 }
 0x22b   :  { %v632_v8 = vadd.f32 %v578_v3, %v504_v41  ;;  %v702_v41 = vld [vmem:[%s3451_s3 + $0xc8] sm:$0xff] }
 0x22c   :  { %v1361_v20 = vld [vmem:[%s3451_s3 + $0x90] sm:$0xff] }
 0x22d   :  { %v1553_v24 = vadd.f32 %v1495_v27, %v1361_v20  ;;  %665 = vst.msk [vmem:[%s3450_s2 + $0xa0] sm:$0xff] %vm41_vm1, %v632_v8  ;;  %v581_v19 = vpop.xlane.xlu1 %580 }
 0x22e   :  { %v633_v25 = vadd.f32 %v581_v19, %v505_v11  ;;  %v1245_v34 = vpop.xlane.xlu0 %1244 }
 0x22f   :  { %1585 = vst.msk [vmem:[%s3451_s3 + $0x90] sm:$0xff] %vm41_vm1, %v1553_v24  ;;  %v1362_v30 = vld [vmem:[%s3451_s3 + $0x98] sm:$0xff] }
 0x230   :  { %v1554_v14 = vadd.f32 %v1498_v0, %v1362_v30  ;;  %666 = vst.msk [vmem:[%s3450_s2 + $0xa8] sm:$0xff] %vm41_vm1, %v633_v25  ;;  %v510_v25 = vld [vmem:[%s3450_s2 + $0xd0] sm:$0xff] }
 0x231   :  { %v1248_v26 = vpop.xlane.xlu1 %1247 }
 0x232   :  { %1586 = vst.msk [vmem:[%s3451_s3 + $0x98] sm:$0xff] %vm41_vm1, %v1554_v14  ;;  %v835_v31 = vpop.xlane.xlu0 %834 }
 0x233   :  { %v889_v16 = vadd.f32 %v835_v31, %v697_v50  ;;  %v511_v50 = vld [vmem:[%s3450_s2 + $0xd8] sm:$0xff] }
 0x234   :  { %v1171_v47 = vld [vmem:[%s3450_s2 + $0xa0] sm:$0xff] }
 0x235   :  { %v1299_v36 = vadd.f32 %v1245_v34, %v1171_v47  ;;  %921 = vst.msk [vmem:[%s3451_s3 + $0xa0] sm:$0xff] %vm41_vm1, %v889_v16  ;;  %v838_v7 = vpop.xlane.xlu1 %837 }
 0x236   :  { %v890_v52 = vadd.f32 %v838_v7, %v698_v9  ;;  %v1501_v58 = vpop.xlane.xlu0 %1500 }
 0x237   :  { %1331 = vst.msk [vmem:[%s3450_s2 + $0xa0] sm:$0xff] %vm41_vm1, %v1299_v36  ;;  %v1172_v51 = vld [vmem:[%s3450_s2 + $0xa8] sm:$0xff] }
 0x238   :  { %v1300_v59 = vadd.f32 %v1248_v26, %v1172_v51  ;;  %922 = vst.msk [vmem:[%s3451_s3 + $0xa8] sm:$0xff] %vm41_vm1, %v890_v52  ;;  %v703_v52 = vld [vmem:[%s3451_s3 + $0xd0] sm:$0xff] }
 0x239   :  { %v1504_v60 = vpop.xlane.xlu1 %1503 }
 0x23a   :  { %1332 = vst.msk [vmem:[%s3450_s2 + $0xa8] sm:$0xff] %vm41_vm1, %v1300_v59  ;;  %v584_v62 = vpop.xlane.xlu0 %583 }
 0x23b   :  { %v634_v1 = vadd.f32 %v584_v62, %v506_v63  ;;  %v704_v63 = vld [vmem:[%s3451_s3 + $0xd8] sm:$0xff]  ;;  %v512_v62 = vld [vmem:[%s3450_s2 + $0xe0] sm:$0xff] }
 0x23c   :  { %v1363_v57 = vld [vmem:[%s3451_s3 + $0xa0] sm:$0xff] }
 0x23d   :  { %v1555_v33 = vadd.f32 %v1501_v58, %v1363_v57  ;;  %667 = vst.msk [vmem:[%s3450_s2 + $0xb0] sm:$0xff] %vm41_vm1, %v634_v1  ;;  %v587_v2 = vpop.xlane.xlu1 %586 }
 0x23e   :  { %v635_v38 = vadd.f32 %v587_v2, %v507_v49  ;;  %v1251_v54 = vpop.xlane.xlu0 %1250 }
 0x23f   :  { %1587 = vst.msk [vmem:[%s3451_s3 + $0xa0] sm:$0xff] %vm41_vm1, %v1555_v33  ;;  %v1364_v5 = vld [vmem:[%s3451_s3 + $0xa8] sm:$0xff] }
 0x240   :  { %v1556_v53 = vadd.f32 %v1504_v60, %v1364_v5  ;;  %668 = vst.msk [vmem:[%s3450_s2 + $0xb8] sm:$0xff] %vm41_vm1, %v635_v38 }
 0x241   :  { %v1254_v35 = vpop.xlane.xlu1 %1253 }
 0x242   :  { %1588 = vst.msk [vmem:[%s3451_s3 + $0xa8] sm:$0xff] %vm41_vm1, %v1556_v53  ;;  %v841_v56 = vpop.xlane.xlu0 %840 }
 0x243   :  { %v891_v17 = vadd.f32 %v841_v56, %v699_v39  ;;  %v705_v56 = vld [vmem:[%s3451_s3 + $0xe0] sm:$0xff] }
 0x244   :  { %v1173_v42 = vld [vmem:[%s3450_s2 + $0xb0] sm:$0xff] }
 0x245   :  { %v1301_v23 = vadd.f32 %v1251_v54, %v1173_v42  ;;  %923 = vst.msk [vmem:[%s3451_s3 + $0xb0] sm:$0xff] %vm41_vm1, %v891_v17  ;;  %v844_v43 = vpop.xlane.xlu1 %843  ;;  %v513_v54 = vld [vmem:[%s3450_s2 + $0xe8] sm:$0xff] }
 0x246   :  { %v892_v12 = vadd.f32 %v844_v43, %v700_v4  ;;  %v1507_v22 = vpop.xlane.xlu0 %1506 }
 0x247   :  { %1333 = vst.msk [vmem:[%s3450_s2 + $0xb0] sm:$0xff] %vm41_vm1, %v1301_v23  ;;  %v1174_v18 = vld [vmem:[%s3450_s2 + $0xb8] sm:$0xff]  ;;  %v706_v23 = vld [vmem:[%s3451_s3 + $0xe8] sm:$0xff] }
 0x248   :  { %v1302_v40 = vadd.f32 %v1254_v35, %v1174_v18  ;;  %924 = vst.msk [vmem:[%s3451_s3 + $0xb8] sm:$0xff] %vm41_vm1, %v892_v12  ;;  %v514_v12 = vld [vmem:[%s3450_s2 + $0xf0] sm:$0xff] }
 0x249   :  { %v1510_v29 = vpop.xlane.xlu1 %1509 }
 0x24a   :  { %1334 = vst.msk [vmem:[%s3450_s2 + $0xb8] sm:$0xff] %vm41_vm1, %v1302_v40  ;;  %v590_v10 = vpop.xlane.xlu0 %589 }
 0x24b   :  { %v636_v37 = vadd.f32 %v590_v10, %v508_v45 }
 0x24c   :  { %v1365_v61 = vld [vmem:[%s3451_s3 + $0xb0] sm:$0xff] }
 0x24d   :  { %v1557_v44 = vadd.f32 %v1507_v22, %v1365_v61  ;;  %669 = vst.msk [vmem:[%s3450_s2 + $0xc0] sm:$0xff] %vm41_vm1, %v636_v37  ;;  %v593_v28 = vpop.xlane.xlu1 %592  ;;  %v515_v37 = vld [vmem:[%s3450_s2 + $0xf8] sm:$0xff] }
 0x24e   :  { %v637_v6 = vadd.f32 %v593_v28, %v509_v55  ;;  %v1257_v13 = vpop.xlane.xlu0 %1256 }
 0x24f   :  { %1589 = vst.msk [vmem:[%s3451_s3 + $0xb0] sm:$0xff] %vm41_vm1, %v1557_v44  ;;  %v1366_v46 = vld [vmem:[%s3451_s3 + $0xb8] sm:$0xff] }
 0x250   :  { %v1558_v15 = vadd.f32 %v1510_v29, %v1366_v46  ;;  %670 = vst.msk [vmem:[%s3450_s2 + $0xc8] sm:$0xff] %vm41_vm1, %v637_v6  ;;  %v707_v6 = vld [vmem:[%s3451_s3 + $0xf0] sm:$0xff] }
 0x251   :  { %v1260_v27 = vpop.xlane.xlu1 %1259 }
 0x252   :  { %1590 = vst.msk [vmem:[%s3451_s3 + $0xb8] sm:$0xff] %vm41_vm1, %v1558_v15  ;;  %v847_v32 = vpop.xlane.xlu0 %846 }
 0x253   :  { %v893_v21 = vadd.f32 %v847_v32, %v701_v48  ;;  %v708_v48 = vld [vmem:[%s3451_s3 + $0xf8] sm:$0xff] }
 0x254   :  { %v1175_v0 = vld [vmem:[%s3450_s2 + $0xc0] sm:$0xff] }
 0x255   :  { %v1303_v3 = vadd.f32 %v1257_v13, %v1175_v0  ;;  %925 = vst.msk [vmem:[%s3451_s3 + $0xc0] sm:$0xff] %vm41_vm1, %v893_v21  ;;  %v850_v8 = vpop.xlane.xlu1 %849 }
 0x256   :  { %v894_v11 = vadd.f32 %v850_v8, %v702_v41  ;;  %v1513_v20 = vpop.xlane.xlu0 %1512 }
 0x257   :  { %1335 = vst.msk [vmem:[%s3450_s2 + $0xc0] sm:$0xff] %vm41_vm1, %v1303_v3  ;;  %v1176_v24 = vld [vmem:[%s3450_s2 + $0xc8] sm:$0xff] }
 0x258   :  { %v1304_v19 = vadd.f32 %v1260_v27, %v1176_v24  ;;  %926 = vst.msk [vmem:[%s3451_s3 + $0xc8] sm:$0xff] %vm41_vm1, %v894_v11 }
 0x259   :  { %v1516_v34 = vpop.xlane.xlu1 %1515 }
 0x25a   :  { %1336 = vst.msk [vmem:[%s3450_s2 + $0xc8] sm:$0xff] %vm41_vm1, %v1304_v19  ;;  %v596_v30 = vpop.xlane.xlu0 %595 }
 0x25b   :  { %v638_v14 = vadd.f32 %v596_v30, %v510_v25 }
 0x25c   :  { %v1367_v26 = vld [vmem:[%s3451_s3 + $0xc0] sm:$0xff] }
 0x25d   :  { %v1559_v31 = vadd.f32 %v1513_v20, %v1367_v26  ;;  %671 = vst.msk [vmem:[%s3450_s2 + $0xd0] sm:$0xff] %vm41_vm1, %v638_v14  ;;  %v599_v16 = vpop.xlane.xlu1 %598 }
 0x25e   :  { %v639_v9 = vadd.f32 %v599_v16, %v511_v50  ;;  %v1263_v47 = vpop.xlane.xlu0 %1262 }
 0x25f   :  { %1591 = vst.msk [vmem:[%s3451_s3 + $0xc0] sm:$0xff] %vm41_vm1, %v1559_v31  ;;  %v1368_v36 = vld [vmem:[%s3451_s3 + $0xc8] sm:$0xff] }
 0x260   :  { %v1560_v7 = vadd.f32 %v1516_v34, %v1368_v36  ;;  %672 = vst.msk [vmem:[%s3450_s2 + $0xd8] sm:$0xff] %vm41_vm1, %v639_v9 }
 0x261   :  { %v1266_v58 = vpop.xlane.xlu1 %1265 }
 0x262   :  { %1592 = vst.msk [vmem:[%s3451_s3 + $0xc8] sm:$0xff] %vm41_vm1, %v1560_v7  ;;  %v853_v51 = vpop.xlane.xlu0 %852 }
 0x263   :  { %v895_v59 = vadd.f32 %v853_v51, %v703_v52 }
 0x264   :  { %v1177_v60 = vld [vmem:[%s3450_s2 + $0xd0] sm:$0xff] }
 0x265   :  { %v1305_v1 = vadd.f32 %v1263_v47, %v1177_v60  ;;  %927 = vst.msk [vmem:[%s3451_s3 + $0xd0] sm:$0xff] %vm41_vm1, %v895_v59  ;;  %v856_v49 = vpop.xlane.xlu1 %855 }
 0x266   :  { %v896_v57 = vadd.f32 %v856_v49, %v704_v63  ;;  %v602_v33 = vpop.xlane.xlu0 %601 }
 0x267   :  { %1337 = vst.msk [vmem:[%s3450_s2 + $0xd0] sm:$0xff] %vm41_vm1, %v1305_v1  ;;  %v1178_v2 = vld [vmem:[%s3450_s2 + $0xd8] sm:$0xff]  ;;  %v640_v38 = vadd.f32 %v602_v33, %v512_v62 }
 0x268   :  { %v1306_v5 = vadd.f32 %v1266_v58, %v1178_v2  ;;  %928 = vst.msk [vmem:[%s3451_s3 + $0xd8] sm:$0xff] %vm41_vm1, %v896_v57 }
 0x269   :  { %673 = vst.msk [vmem:[%s3450_s2 + $0xe0] sm:$0xff] %vm41_vm1, %v640_v38  ;;  %v605_v53 = vpop.xlane.xlu1 %604 }
 0x26a   :  { %1338 = vst.msk [vmem:[%s3450_s2 + $0xd8] sm:$0xff] %vm41_vm1, %v1306_v5  ;;  %v641_v39 = vadd.f32 %v605_v53, %v513_v54  ;;  %v1269_v35 = vpop.xlane.xlu0 %1268 }
 0x26c   :  { %674 = vst.msk [vmem:[%s3450_s2 + $0xe8] sm:$0xff] %vm41_vm1, %v641_v39  ;;  %v1369_v3 = vld [vmem:[%s3451_s3 + $0xd0] sm:$0xff] }
 0x26d   :  { %v1272_v17 = vpop.xlane.xlu1 %1271 }
 0x26e   :  { %v859_v4 = vpop.xlane.xlu0 %858 }
 0x26f   :  { %v897_v42 = vadd.f32 %v859_v4, %v705_v56  ;;  %v1370_v19 = vld [vmem:[%s3451_s3 + $0xd8] sm:$0xff] }
 0x270   :  { %v1179_v43 = vld [vmem:[%s3450_s2 + $0xe0] sm:$0xff] }
 0x271   :  { %v1307_v22 = vadd.f32 %v1269_v35, %v1179_v43  ;;  %929 = vst.msk [vmem:[%s3451_s3 + $0xe0] sm:$0xff] %vm41_vm1, %v897_v42  ;;  %v862_v18 = vpop.xlane.xlu1 %861 }
 0x272   :  { %v898_v40 = vadd.f32 %v862_v18, %v706_v23  ;;  %v608_v45 = vpop.xlane.xlu0 %607 }
 0x273   :  { %1339 = vst.msk [vmem:[%s3450_s2 + $0xe0] sm:$0xff] %vm41_vm1, %v1307_v22  ;;  %v1180_v29 = vld [vmem:[%s3450_s2 + $0xe8] sm:$0xff]  ;;  %v642_v10 = vadd.f32 %v608_v45, %v514_v12 }
 0x274   :  { %v1308_v55 = vadd.f32 %v1272_v17, %v1180_v29  ;;  %930 = vst.msk [vmem:[%s3451_s3 + $0xe8] sm:$0xff] %vm41_vm1, %v898_v40 }
 0x275   :  { %675 = vst.msk [vmem:[%s3450_s2 + $0xf0] sm:$0xff] %vm41_vm1, %v642_v10  ;;  %v611_v61 = vpop.xlane.xlu1 %610 }
 0x276   :  { %1340 = vst.msk [vmem:[%s3450_s2 + $0xe8] sm:$0xff] %vm41_vm1, %v1308_v55  ;;  %v643_v44 = vadd.f32 %v611_v61, %v515_v37  ;;  %v1275_v28 = vpop.xlane.xlu0 %1274 }
 0x278   :  { %676 = vst.msk [vmem:[%s3450_s2 + $0xf8] sm:$0xff] %vm41_vm1, %v643_v44  ;;  %v1371_v30 = vld [vmem:[%s3451_s3 + $0xe0] sm:$0xff] }
 0x279   :  { %v1278_v13 = vpop.xlane.xlu1 %1277 }
 0x27a   :  { %v865_v46 = vpop.xlane.xlu0 %864 }
 0x27b   :  { %v899_v15 = vadd.f32 %v865_v46, %v707_v6  ;;  %v1372_v26 = vld [vmem:[%s3451_s3 + $0xe8] sm:$0xff] }
 0x27c   :  { %v1181_v27 = vld [vmem:[%s3450_s2 + $0xf0] sm:$0xff] }
 0x27d   :  { %v1309_v32 = vadd.f32 %v1275_v28, %v1181_v27  ;;  %931 = vst.msk [vmem:[%s3451_s3 + $0xf0] sm:$0xff] %vm41_vm1, %v899_v15  ;;  %v868_v21 = vpop.xlane.xlu1 %867 }
 0x27e   :  { %v900_v41 = vadd.f32 %v868_v21, %v708_v48  ;;  %v1519_v0 = vpop.xlane.xlu0 %1518 }
 0x27f   :  { %1341 = vst.msk [vmem:[%s3450_s2 + $0xf0] sm:$0xff] %vm41_vm1, %v1309_v32  ;;  %v1182_v8 = vld [vmem:[%s3450_s2 + $0xf8] sm:$0xff]  ;;  %v1561_v11 = vadd.f32 %v1519_v0, %v1369_v3 }
 0x280   :  { %v1310_v20 = vadd.f32 %v1278_v13, %v1182_v8  ;;  %932 = vst.msk [vmem:[%s3451_s3 + $0xf8] sm:$0xff] %vm41_vm1, %v900_v41 }
 0x281   :  { %1593 = vst.msk [vmem:[%s3451_s3 + $0xd0] sm:$0xff] %vm41_vm1, %v1561_v11  ;;  %v1522_v24 = vpop.xlane.xlu1 %1521 }
 0x282   :  { %1342 = vst.msk [vmem:[%s3450_s2 + $0xf8] sm:$0xff] %vm41_vm1, %v1310_v20  ;;  %v1562_v25 = vadd.f32 %v1522_v24, %v1370_v19  ;;  %v1525_v34 = vpop.xlane.xlu0 %1524 }
 0x283   :  { %v1563_v14 = vadd.f32 %v1525_v34, %v1371_v30 }
 0x284   :  { %1594 = vst.msk [vmem:[%s3451_s3 + $0xd8] sm:$0xff] %vm41_vm1, %v1562_v25  ;;  %v1373_v9 = vld [vmem:[%s3451_s3 + $0xf0] sm:$0xff] }
 0x285   :  { %1595 = vst.msk [vmem:[%s3451_s3 + $0xe0] sm:$0xff] %vm41_vm1, %v1563_v14  ;;  %v1528_v50 = vpop.xlane.xlu1 %1527 }
 0x286   :  { %v1564_v31 = vadd.f32 %v1528_v50, %v1372_v26  ;;  %v1531_v16 = vpop.xlane.xlu0 %1530 }
 0x287   :  { %v1565_v47 = vadd.f32 %v1531_v16, %v1373_v9  ;;  %v1374_v7 = vld [vmem:[%s3451_s3 + $0xf8] sm:$0xff] }
 0x288   :  { %1596 = vst.msk [vmem:[%s3451_s3 + $0xe8] sm:$0xff] %vm41_vm1, %v1564_v31 }
 0x289   :  { %1597 = vst.msk [vmem:[%s3451_s3 + $0xf0] sm:$0xff] %vm41_vm1, %v1565_v47  ;;  %v1534_v36 = vpop.xlane.xlu1 %1533 }
 0x28a   :  { %v1566_v52 = vadd.f32 %v1534_v36, %v1374_v7 }
 0x28c   :  { %1598 = vst.msk [vmem:[%s3451_s3 + $0xf8] sm:$0xff] %vm41_vm1, %v1566_v52 }
 0x28d   :  { %1607 = vsyncpa [#allocation3], 1 }

</bundles_post_ra>
